<compile_context>
chip_gen: v7x
topology: tpu7x:2x2x1
jax: 0.10.0
libtpu: 0.0.40
codegen_flags: <defaults>
</compile_context>

<pallas_src>
import functools

import jax
import jax.numpy as jnp
from jax.experimental import pallas as pl


# --------------------------- static layout tables ---------------------------

# Packed-weight segments: (name, rows(K), cols(Cout)); row offsets are 8-aligned
# so every in-kernel slice starts on a sublane boundary.
_W_SEGMENTS = (
    ("w1",  27, 24),    # stage1 3x3 conv (im2col K = 9*3)
    ("w31", 24, 16),    # stage3_1 1x1
    ("w32", 144, 16),   # stage3_2 3x3 (all 9 taps used across the 2x2 outputs)
    ("w33", 16, 64),    # stage3_3 1x1
    ("w41", 64, 32),    # stage4_1 1x1
    ("w42", 128, 32),   # stage4_2 3x3, only non-padding taps (4,5,7,8) kept
    ("w43", 32, 128),   # stage4_3 1x1
    ("w51", 128, 32),   # stage5_1 1x1
    ("w52", 32, 32),    # stage5_2 3x3, only center tap (4) kept
    ("w53", 32, 128),   # stage5_3 1x1
)
_S42_TAPS = (4, 5, 7, 8)
_S52_TAPS = (4,)


def _w_offsets():
    offs, o = {}, 0
    for name, k, _ in _W_SEGMENTS:
        offs[name] = o
        o += -(-k // 8) * 8
    return offs, o


_WOFF, _WROWS = _w_offsets()
_WDIM = {name: (k, c) for name, k, c in _W_SEGMENTS}

# Packed per-channel vectors (one f32 (16,128) slab).
_V = {"bn_g": 0, "bn_b": 1, "b31": 2, "b32": 3, "b33": 4, "b41": 5,
      "b42": 6, "b43": 7, "b51": 8, "b52": 9, "b53": 10}
_VROWS = 16


def _s2_conv_map(h, w):
    """3x3 / stride-2 / pad-1 conv geometry on an (h,w) grid: for each output
    position (row-major) the list of (valid input flat position, tap index)."""
    ho = (h + 2 - 3) // 2 + 1
    wo = (w + 2 - 3) // 2 + 1
    out = []
    for oh in range(ho):
        for ow in range(wo):
            pairs = []
            for i in range(3):
                for j in range(3):
                    ih, iw = 2 * oh + i - 1, 2 * ow + j - 1
                    if 0 <= ih < h and 0 <= iw < w:
                        pairs.append((ih * w + iw, i * 3 + j))
            out.append(pairs)
    return out


# ------------------------------ Pallas kernel -------------------------------

def _wechat_kernel(p_ref, w_ref, v_ref, o_ref, *, n, eps):
    """Whole WeChat conv stack fused in one VMEM-resident kernel.

    p_ref: (64n, 27) bf16  im2col patches of the BN'd input, rows n-major.
    w_ref: (632, 128) bf16 packed weights (see _W_SEGMENTS).
    v_ref: (16, 128) f32   packed BN gamma/beta + biases (see _V).
    o_ref: (2n, 128) f32   rows [0:n] = stage_4_8, rows [n:2n] = stage_5_4.
    """
    f32 = jnp.float32
    bf16 = jnp.bfloat16

    def wfull(name):
        off = _WOFF[name]
        k, c = _WDIM[name]
        return w_ref[off:off + k, 0:c]

    def wtap(name, block, cin):
        off = _WOFF[name]
        _, c = _WDIM[name]
        return w_ref[off + block * cin: off + (block + 1) * cin, 0:c]

    def vec(row, c):
        return v_ref[row:row + 1, 0:c]

    def conv1x1(x, wname, brow, cout, relu):
        y = jnp.dot(x.astype(bf16), wfull(wname), preferred_element_type=f32)
        y = y + vec(brow, cout)
        return jnp.maximum(y, 0.0) if relu else y

    def conv_s2(x, cin, wname, stored_taps, tap_map, brow, cout):
        # 3x3/stride-2/pad-1 conv via per-tap matmul accumulation on pos-major
        # (n-minor) row slabs: only non-padding taps are ever multiplied.
        xb = x.astype(bf16)
        outs = []
        for pairs in tap_map:
            acc = None
            for p, t in pairs:
                wt = wtap(wname, stored_taps.index(t), cin)
                y = jnp.dot(xb[p * n:(p + 1) * n, :], wt,
                            preferred_element_type=f32)
                acc = y if acc is None else acc + y
            outs.append(acc)
        y = outs[0] if len(outs) == 1 else jnp.concatenate(outs, axis=0)
        return y + vec(brow, cout)

    # ---- stage1: 3x3/s2 conv (MXU) + training-mode BN + ReLU ----------------
    # Conv bias omitted: exactly cancelled by the batch-mean subtraction below.
    x1 = jnp.dot(p_ref[...], wfull("w1"), preferred_element_type=f32)   # (64n, 24)
    mu = jnp.mean(x1, axis=0, keepdims=True)
    var = jnp.mean((x1 - mu) ** 2, axis=0, keepdims=True)
    x1 = (x1 - mu) * jax.lax.rsqrt(var + eps)
    x1 = x1 * vec(_V["bn_g"], 24) + vec(_V["bn_b"], 24)
    x1 = jnp.maximum(x1, 0.0)

    # ---- stage2: separable 3x3/s2 maxpool, 8x8 -> 3x3, emit pos-major slabs --
    x1 = x1.reshape(n, 8, 8, 24)
    hp = [jnp.max(x1[:, 2 * i:2 * i + 3, :, :], axis=1) for i in range(3)]  # (n,8,24)
    slabs = []
    for i in range(3):
        for j in range(3):
            slabs.append(jnp.max(hp[i][:, 2 * j:2 * j + 3, :], axis=1))     # (n,24)
    xp = jnp.concatenate(slabs, axis=0)                    # (9n, 24), rows = pos*n + b

    # ---- stage3: 1x1+ReLU, 3x3/s2, 1x1+ReLU ---------------------------------
    x3 = conv1x1(xp, "w31", _V["b31"], 16, relu=True)                       # (9n, 16)
    y32 = conv_s2(x3, 16, "w32", tuple(range(9)), _s2_conv_map(3, 3),
                  _V["b32"], 16)                                            # (4n, 16)
    y33 = conv1x1(y32, "w33", _V["b33"], 64, relu=True)                     # (4n, 64)
    # TODO(synk): stage3_res_block (undefined `residual_block`) -> identity.

    # ---- stage4: 1x1+ReLU, 3x3/s2, 1x1+ReLU -> stage_4_8 --------------------
    y41 = conv1x1(y33, "w41", _V["b41"], 32, relu=True)                     # (4n, 32)
    y42 = conv_s2(y41, 32, "w42", _S42_TAPS, _s2_conv_map(2, 2),
                  _V["b42"], 32)                                            # (n, 32)
    y43 = conv1x1(y42, "w43", _V["b43"], 128, relu=True)                    # (n, 128)
    # TODO(synk): stage4_res_block -> identity; y43 is stage_4_8.

    # ---- stage5: 1x1+ReLU, 3x3/s2, 1x1+ReLU -> stage_5_4 --------------------
    y51 = conv1x1(y43, "w51", _V["b51"], 32, relu=True)                     # (n, 32)
    y52 = conv_s2(y51, 32, "w52", _S52_TAPS, _s2_conv_map(1, 1),
                  _V["b52"], 32)                                            # (n, 32)
    y54 = conv1x1(y52, "w53", _V["b53"], 128, relu=True)                    # (n, 128)
    # TODO(synk): stage5_res_block -> identity; y54 is stage_5_4.

    # Single lane-dense packed store: rows [0:n]=stage_4_8, [n:2n]=stage_5_4.
    o_ref[...] = jnp.concatenate([y43, y54], axis=0)


# ------------------------------ JAX-side glue --------------------------------

def _w1x1(w):
    # PyTorch (Cout, Cin, 1, 1) -> (Cin, Cout) matmul weight.
    return jnp.transpose(w[:, :, 0, 0], (1, 0))


def _w3x3(w):
    # PyTorch (Cout, Cin, KH, KW) -> (KH*KW*Cin, Cout), tap-major / channel-minor.
    cout, cin, kh, kw = w.shape
    return jnp.transpose(w, (2, 3, 1, 0)).reshape(kh * kw * cin, cout)


def _slice_taps(w2d, cin, taps):
    return jnp.concatenate([w2d[t * cin:(t + 1) * cin] for t in taps], axis=0)


def _im2col(x, kh, kw, stride, pad):
    # NHWC -> (N*Ho*Wo, kh*kw*C) patches, rows n-major. Tiny XLA prologue.
    if pad:
        x = jnp.pad(x, ((0, 0), (pad, pad), (pad, pad), (0, 0)))
    n, hp_, wp_, c = x.shape
    ho = (hp_ - kh) // stride + 1
    wo = (wp_ - kw) // stride + 1
    taps = [x[:, i:i + stride * ho:stride, j:j + stride * wo:stride, :]
            for i in range(kh) for j in range(kw)]
    patches = jnp.concatenate(taps, axis=-1).reshape(n * ho * wo, kh * kw * c)
    return patches, ho, wo


def prepare_params(p):
    """One-time (outside jit) weight layout/cast prep: pack all matmul weights into
    one bf16 slab and all per-channel vectors into one f32 slab."""
    segs = {
        "w1": _w3x3(p["s1_w"]),
        "w31": _w1x1(p["s3_1_w"]),
        "w32": _w3x3(p["s3_2_w"]),
        "w33": _w1x1(p["s3_3_w"]),
        "w41": _w1x1(p["s4_1_w"]),
        "w42": _slice_taps(_w3x3(p["s4_2_w"]), 32, _S42_TAPS),
        "w43": _w1x1(p["s4_3_w"]),
        "w51": _w1x1(p["s5_1_w"]),
        "w52": _slice_taps(_w3x3(p["s5_2_w"]), 32, _S52_TAPS),
        "w53": _w1x1(p["s5_3_w"]),
    }
    wpack = jnp.zeros((_WROWS, 128), jnp.float32)
    for name, k, c in _W_SEGMENTS:
        w = segs[name]
        assert w.shape == (k, c), (name, w.shape, (k, c))
        wpack = wpack.at[_WOFF[name]:_WOFF[name] + k, :c].set(w)
    wpack = wpack.astype(jnp.bfloat16)

    vpack = jnp.zeros((_VROWS, 128), jnp.float32)
    vsrc = {"bn_g": p["s1_bn_g"], "bn_b": p["s1_bn_b"], "b31": p["s3_1_b"],
            "b32": p["s3_2_b"], "b33": p["s3_3_b"], "b41": p["s4_1_b"],
            "b42": p["s4_2_b"], "b43": p["s4_3_b"], "b51": p["s5_1_b"],
            "b52": p["s5_2_b"], "b53": p["s5_3_b"]}
    for name, v in vsrc.items():
        vpack = vpack.at[_V[name], :v.shape[0]].set(v)
    # NOTE: p["s1_b"] (stage1 conv bias) is intentionally not packed — it is
    # cancelled exactly by the batch-stat BN mean subtraction.
    return {"wpack": wpack, "vpack": vpack,
            "data_bn_g": p["data_bn_g"], "data_bn_b": p["data_bn_b"]}


# ------------------------------- Parameters ----------------------------------

def _conv_params(key, cout, cin, k):
    kw_key, kb_key = jax.random.split(key)
    bound = (cin * k * k) ** -0.5  # PyTorch-style kaiming-uniform bound
    w = jax.random.uniform(kw_key, (cout, cin, k, k), jnp.float32, -bound, bound)
    b = jax.random.uniform(kb_key, (cout,), jnp.float32, -bound, bound)
    return w, b


def init_params(key):
    keys = jax.random.split(key, 10)
    p = {}
    # TODO(synk): Batchnorm2d_filler uses `layer.weights` (AttributeError in
    # PyTorch); the intended (PyTorch-default) init weight=1, bias=0 is used here.
    p["data_bn_g"], p["data_bn_b"] = jnp.ones((3,), jnp.float32), jnp.zeros((3,), jnp.float32)
    p["s1_bn_g"], p["s1_bn_b"] = jnp.ones((24,), jnp.float32), jnp.zeros((24,), jnp.float32)
    p["s1_w"], p["s1_b"] = _conv_params(keys[0], 24, 3, 3)
    p["s3_1_w"], p["s3_1_b"] = _conv_params(keys[1], 16, 24, 1)
    p["s3_2_w"], p["s3_2_b"] = _conv_params(keys[2], 16, 16, 3)
    p["s3_3_w"], p["s3_3_b"] = _conv_params(keys[3], 64, 16, 1)
    p["s4_1_w"], p["s4_1_b"] = _conv_params(keys[4], 32, 64, 1)
    p["s4_2_w"], p["s4_2_b"] = _conv_params(keys[5], 32, 32, 3)
    p["s4_3_w"], p["s4_3_b"] = _conv_params(keys[6], 128, 32, 1)
    p["s5_1_w"], p["s5_1_b"] = _conv_params(keys[7], 32, 128, 1)
    p["s5_2_w"], p["s5_2_b"] = _conv_params(keys[8], 32, 32, 3)
    p["s5_3_w"], p["s5_3_b"] = _conv_params(keys[9], 128, 32, 1)
    return p


# --------------------------------- Forward -----------------------------------

def wechat_forward(x_nchw, prep):
    n, c, h, w = x_nchw.shape
    assert (c, h, w) == (3, 16, 16), "kernel specialized to 3x16x16 inputs"
    x = jnp.transpose(x_nchw, (0, 2, 3, 1))                 # NCHW -> NHWC

    # data BN (3 channels, batch stats) + stage1 im2col: tiny XLA prologue.
    mu = jnp.mean(x, axis=(0, 1, 2), keepdims=True)
    var = jnp.mean((x - mu) ** 2, axis=(0, 1, 2), keepdims=True)
    x = (x - mu) * jax.lax.rsqrt(var + 1e-5) * prep["data_bn_g"] + prep["data_bn_b"]
    patches, _, _ = _im2col(x, 3, 3, 2, 1)                  # (64n, 27)

    # TODO(synk): original forward re-applies the 3-channel data_bn_scale to the
    # 24-channel stage1 output, reuses mismatched 1x1 convs, references undefined
    # residual blocks and returns None; the fused kernel follows the declared
    # layer stack (stage1_bn_scale, *_conv2/*_conv3, identity res blocks) instead.
    out = pl.pallas_call(
        functools.partial(_wechat_kernel, n=n, eps=1e-5),
        out_shape=jax.ShapeDtypeStruct((2 * n, 128), jnp.float32),
    )(patches.astype(jnp.bfloat16), prep["wpack"], prep["vpack"])

    stage_4_8 = out[:n].reshape(n, 128, 1, 1)               # NCHW, spatial 1x1
    stage_5_4 = out[n:].reshape(n, 128, 1, 1)
    return stage_4_8, stage_5_4


if __name__ == "__main__":
    key = jax.random.PRNGKey(0)
    x = jax.random.normal(key, (2, 3, 16, 16), jnp.float32)  # NCHW, like PyTorch
    params = init_params(jax.random.PRNGKey(1))
    prep = prepare_params(params)                            # one-time, outside jit
    fwd = jax.jit(wechat_forward)
    stage_4_8, stage_5_4 = fwd(x, prep)
    jax.block_until_ready((stage_4_8, stage_5_4))
    assert stage_4_8.shape == (2, 128, 1, 1) and stage_5_4.shape == (2, 128, 1, 1)
    print("KERNEL_OK")
</pallas_src>

<mosaic_0001>
module attributes {stable_mosaic.version = 11 : i64} {
  func.func @_wechat_kernel(%arg0: memref<128x27xbf16, #tpu.memory_space<vmem>>, %arg1: memref<632x128xbf16, #tpu.memory_space<vmem>>, %arg2: memref<16x128xf32, #tpu.memory_space<vmem>>, %arg3: memref<4x128xf32, #tpu.memory_space<vmem>>) attributes {dimension_semantics = [], scalar_prefetch = 0 : i64, scratch_operands = 0 : i64, tpu.core_type = #tpu.core_type<tc>} {
    %c0 = arith.constant 0 : index
    %c0_0 = arith.constant 0 : index
    %0 = vector.load %arg0[%c0, %c0_0] : memref<128x27xbf16, #tpu.memory_space<vmem>>, vector<128x27xbf16>
    %c0_1 = arith.constant 0 : index
    %c0_2 = arith.constant 0 : index
    %1 = vector.load %arg1[%c0_1, %c0_2] : memref<632x128xbf16, #tpu.memory_space<vmem>>, vector<27x24xbf16>
    %cst = arith.constant dense<0.000000e+00> : vector<128x24xf32>
    %2 = tpu.matmul %0, %1, %cst {dimension_numbers = #tpu.dot_dimension_numbers<[1], [0], [0], [1], [0, 0, 1, 1], [], []>} : vector<128x27xbf16>, vector<27x24xbf16>, vector<128x24xf32> -> vector<128x24xf32>
    %cst_3 = arith.constant dense<0.000000e+00> : vector<24xf32>
    %3 = vector.multi_reduction <add>, %2, %cst_3 [0] : vector<128x24xf32> to vector<24xf32>
    %4 = vector.shape_cast %3 : vector<24xf32> to vector<1x24xf32>
    %cst_4 = arith.constant 1.280000e+02 : f32
    %5 = vector.broadcast %cst_4 : f32 to vector<1x24xf32>
    %6 = arith.divf %4, %5 : vector<1x24xf32>
    %7 = vector.broadcast %6 : vector<1x24xf32> to vector<128x24xf32>
    %8 = arith.subf %2, %7 : vector<128x24xf32>
    %9 = arith.mulf %8, %8 : vector<128x24xf32>
    %cst_5 = arith.constant dense<0.000000e+00> : vector<24xf32>
    %10 = vector.multi_reduction <add>, %9, %cst_5 [0] : vector<128x24xf32> to vector<24xf32>
    %11 = vector.shape_cast %10 : vector<24xf32> to vector<1x24xf32>
    %cst_6 = arith.constant 1.280000e+02 : f32
    %12 = vector.broadcast %cst_6 : f32 to vector<1x24xf32>
    %13 = arith.divf %11, %12 : vector<1x24xf32>
    %14 = vector.broadcast %6 : vector<1x24xf32> to vector<128x24xf32>
    %15 = arith.subf %2, %14 : vector<128x24xf32>
    %cst_7 = arith.constant 9.99999974E-6 : f32
    %16 = vector.broadcast %cst_7 : f32 to vector<1x24xf32>
    %17 = arith.addf %13, %16 : vector<1x24xf32>
    %18 = math.rsqrt %17 : vector<1x24xf32>
    %19 = vector.broadcast %18 : vector<1x24xf32> to vector<128x24xf32>
    %20 = arith.mulf %15, %19 : vector<128x24xf32>
    %c0_8 = arith.constant 0 : index
    %c0_9 = arith.constant 0 : index
    %21 = vector.load %arg2[%c0_8, %c0_9] : memref<16x128xf32, #tpu.memory_space<vmem>>, vector<1x24xf32>
    %22 = vector.broadcast %21 : vector<1x24xf32> to vector<128x24xf32>
    %23 = arith.mulf %20, %22 : vector<128x24xf32>
    %c1 = arith.constant 1 : index
    %c0_10 = arith.constant 0 : index
    %24 = vector.load %arg2[%c1, %c0_10] : memref<16x128xf32, #tpu.memory_space<vmem>>, vector<1x24xf32>
    %25 = vector.broadcast %24 : vector<1x24xf32> to vector<128x24xf32>
    %26 = arith.addf %23, %25 : vector<128x24xf32>
    %cst_11 = arith.constant 0.000000e+00 : f32
    %27 = vector.broadcast %cst_11 : f32 to vector<128x24xf32>
    %28 = arith.maximumf %26, %27 : vector<128x24xf32>
    %29 = vector.shape_cast %28 : vector<128x24xf32> to vector<2x8x8x24xf32>
    %30 = vector.extract_strided_slice %29 {offsets = [0, 0, 0, 0], sizes = [2, 3, 8, 24], strides = [1, 1, 1, 1]} : vector<2x8x8x24xf32> to vector<2x3x8x24xf32>
    %cst_12 = arith.constant dense<0xFF800000> : vector<2x8x24xf32>
    %31 = vector.multi_reduction <maximumf>, %30, %cst_12 [1] : vector<2x3x8x24xf32> to vector<2x8x24xf32>
    %32 = vector.extract_strided_slice %29 {offsets = [0, 2, 0, 0], sizes = [2, 3, 8, 24], strides = [1, 1, 1, 1]} : vector<2x8x8x24xf32> to vector<2x3x8x24xf32>
    %cst_13 = arith.constant dense<0xFF800000> : vector<2x8x24xf32>
    %33 = vector.multi_reduction <maximumf>, %32, %cst_13 [1] : vector<2x3x8x24xf32> to vector<2x8x24xf32>
    %34 = vector.extract_strided_slice %29 {offsets = [0, 4, 0, 0], sizes = [2, 3, 8, 24], strides = [1, 1, 1, 1]} : vector<2x8x8x24xf32> to vector<2x3x8x24xf32>
    %cst_14 = arith.constant dense<0xFF800000> : vector<2x8x24xf32>
    %35 = vector.multi_reduction <maximumf>, %34, %cst_14 [1] : vector<2x3x8x24xf32> to vector<2x8x24xf32>
    %36 = vector.extract_strided_slice %31 {offsets = [0, 0, 0], sizes = [2, 3, 24], strides = [1, 1, 1]} : vector<2x8x24xf32> to vector<2x3x24xf32>
    %cst_15 = arith.constant dense<0xFF800000> : vector<2x24xf32>
    %37 = vector.multi_reduction <maximumf>, %36, %cst_15 [1] : vector<2x3x24xf32> to vector<2x24xf32>
    %38 = vector.extract_strided_slice %31 {offsets = [0, 2, 0], sizes = [2, 3, 24], strides = [1, 1, 1]} : vector<2x8x24xf32> to vector<2x3x24xf32>
    %cst_16 = arith.constant dense<0xFF800000> : vector<2x24xf32>
    %39 = vector.multi_reduction <maximumf>, %38, %cst_16 [1] : vector<2x3x24xf32> to vector<2x24xf32>
    %40 = vector.extract_strided_slice %31 {offsets = [0, 4, 0], sizes = [2, 3, 24], strides = [1, 1, 1]} : vector<2x8x24xf32> to vector<2x3x24xf32>
    %cst_17 = arith.constant dense<0xFF800000> : vector<2x24xf32>
    %41 = vector.multi_reduction <maximumf>, %40, %cst_17 [1] : vector<2x3x24xf32> to vector<2x24xf32>
    %42 = vector.extract_strided_slice %33 {offsets = [0, 0, 0], sizes = [2, 3, 24], strides = [1, 1, 1]} : vector<2x8x24xf32> to vector<2x3x24xf32>
    %cst_18 = arith.constant dense<0xFF800000> : vector<2x24xf32>
    %43 = vector.multi_reduction <maximumf>, %42, %cst_18 [1] : vector<2x3x24xf32> to vector<2x24xf32>
    %44 = vector.extract_strided_slice %33 {offsets = [0, 2, 0], sizes = [2, 3, 24], strides = [1, 1, 1]} : vector<2x8x24xf32> to vector<2x3x24xf32>
    %cst_19 = arith.constant dense<0xFF800000> : vector<2x24xf32>
    %45 = vector.multi_reduction <maximumf>, %44, %cst_19 [1] : vector<2x3x24xf32> to vector<2x24xf32>
    %46 = vector.extract_strided_slice %33 {offsets = [0, 4, 0], sizes = [2, 3, 24], strides = [1, 1, 1]} : vector<2x8x24xf32> to vector<2x3x24xf32>
    %cst_20 = arith.constant dense<0xFF800000> : vector<2x24xf32>
    %47 = vector.multi_reduction <maximumf>, %46, %cst_20 [1] : vector<2x3x24xf32> to vector<2x24xf32>
    %48 = vector.extract_strided_slice %35 {offsets = [0, 0, 0], sizes = [2, 3, 24], strides = [1, 1, 1]} : vector<2x8x24xf32> to vector<2x3x24xf32>
    %cst_21 = arith.constant dense<0xFF800000> : vector<2x24xf32>
    %49 = vector.multi_reduction <maximumf>, %48, %cst_21 [1] : vector<2x3x24xf32> to vector<2x24xf32>
    %50 = vector.extract_strided_slice %35 {offsets = [0, 2, 0], sizes = [2, 3, 24], strides = [1, 1, 1]} : vector<2x8x24xf32> to vector<2x3x24xf32>
    %cst_22 = arith.constant dense<0xFF800000> : vector<2x24xf32>
    %51 = vector.multi_reduction <maximumf>, %50, %cst_22 [1] : vector<2x3x24xf32> to vector<2x24xf32>
    %52 = vector.extract_strided_slice %35 {offsets = [0, 4, 0], sizes = [2, 3, 24], strides = [1, 1, 1]} : vector<2x8x24xf32> to vector<2x3x24xf32>
    %cst_23 = arith.constant dense<0xFF800000> : vector<2x24xf32>
    %53 = vector.multi_reduction <maximumf>, %52, %cst_23 [1] : vector<2x3x24xf32> to vector<2x24xf32>
    %54 = tpu.concatenate %37, %39, %41, %43, %45, %47, %49, %51, %53 in 0 : vector<2x24xf32>, vector<2x24xf32>, vector<2x24xf32>, vector<2x24xf32>, vector<2x24xf32>, vector<2x24xf32>, vector<2x24xf32>, vector<2x24xf32>, vector<2x24xf32> -> vector<18x24xf32>
    %55 = arith.truncf %54 : vector<18x24xf32> to vector<18x24xbf16>
    %c32 = arith.constant 32 : index
    %c0_24 = arith.constant 0 : index
    %56 = vector.load %arg1[%c32, %c0_24] : memref<632x128xbf16, #tpu.memory_space<vmem>>, vector<24x16xbf16>
    %cst_25 = arith.constant dense<0.000000e+00> : vector<18x16xf32>
    %57 = tpu.matmul %55, %56, %cst_25 {dimension_numbers = #tpu.dot_dimension_numbers<[1], [0], [0], [1], [0, 0, 1, 1], [], []>} : vector<18x24xbf16>, vector<24x16xbf16>, vector<18x16xf32> -> vector<18x16xf32>
    %c2 = arith.constant 2 : index
    %c0_26 = arith.constant 0 : index
    %58 = vector.load %arg2[%c2, %c0_26] : memref<16x128xf32, #tpu.memory_space<vmem>>, vector<1x16xf32>
    %59 = vector.broadcast %58 : vector<1x16xf32> to vector<18x16xf32>
    %60 = arith.addf %57, %59 : vector<18x16xf32>
    %cst_27 = arith.constant 0.000000e+00 : f32
    %61 = vector.broadcast %cst_27 : f32 to vector<18x16xf32>
    %62 = arith.maximumf %60, %61 : vector<18x16xf32>
    %63 = arith.truncf %62 : vector<18x16xf32> to vector<18x16xbf16>
    %c120 = arith.constant 120 : index
    %c0_28 = arith.constant 0 : index
    %64 = vector.load %arg1[%c120, %c0_28] : memref<632x128xbf16, #tpu.memory_space<vmem>>, vector<16x16xbf16>
    %65 = vector.extract_strided_slice %63 {offsets = [0, 0], sizes = [2, 16], strides = [1, 1]} : vector<18x16xbf16> to vector<2x16xbf16>
    %cst_29 = arith.constant dense<0.000000e+00> : vector<2x16xf32>
    %66 = tpu.matmul %65, %64, %cst_29 {dimension_numbers = #tpu.dot_dimension_numbers<[1], [0], [0], [1], [0, 0, 1, 1], [], []>} : vector<2x16xbf16>, vector<16x16xbf16>, vector<2x16xf32> -> vector<2x16xf32>
    %c136 = arith.constant 136 : index
    %c0_30 = arith.constant 0 : index
    %67 = vector.load %arg1[%c136, %c0_30] : memref<632x128xbf16, #tpu.memory_space<vmem>>, vector<16x16xbf16>
    %68 = vector.extract_strided_slice %63 {offsets = [2, 0], sizes = [2, 16], strides = [1, 1]} : vector<18x16xbf16> to vector<2x16xbf16>
    %cst_31 = arith.constant dense<0.000000e+00> : vector<2x16xf32>
    %69 = tpu.matmul %68, %67, %cst_31 {dimension_numbers = #tpu.dot_dimension_numbers<[1], [0], [0], [1], [0, 0, 1, 1], [], []>} : vector<2x16xbf16>, vector<16x16xbf16>, vector<2x16xf32> -> vector<2x16xf32>
    %70 = arith.addf %66, %69 : vector<2x16xf32>
    %c168 = arith.constant 168 : index
    %c0_32 = arith.constant 0 : index
    %71 = vector.load %arg1[%c168, %c0_32] : memref<632x128xbf16, #tpu.memory_space<vmem>>, vector<16x16xbf16>
    %72 = vector.extract_strided_slice %63 {offsets = [6, 0], sizes = [2, 16], strides = [1, 1]} : vector<18x16xbf16> to vector<2x16xbf16>
    %cst_33 = arith.constant dense<0.000000e+00> : vector<2x16xf32>
    %73 = tpu.matmul %72, %71, %cst_33 {dimension_numbers = #tpu.dot_dimension_numbers<[1], [0], [0], [1], [0, 0, 1, 1], [], []>} : vector<2x16xbf16>, vector<16x16xbf16>, vector<2x16xf32> -> vector<2x16xf32>
    %74 = arith.addf %70, %73 : vector<2x16xf32>
    %c184 = arith.constant 184 : index
    %c0_34 = arith.constant 0 : index
    %75 = vector.load %arg1[%c184, %c0_34] : memref<632x128xbf16, #tpu.memory_space<vmem>>, vector<16x16xbf16>
    %76 = vector.extract_strided_slice %63 {offsets = [8, 0], sizes = [2, 16], strides = [1, 1]} : vector<18x16xbf16> to vector<2x16xbf16>
    %cst_35 = arith.constant dense<0.000000e+00> : vector<2x16xf32>
    %77 = tpu.matmul %76, %75, %cst_35 {dimension_numbers = #tpu.dot_dimension_numbers<[1], [0], [0], [1], [0, 0, 1, 1], [], []>} : vector<2x16xbf16>, vector<16x16xbf16>, vector<2x16xf32> -> vector<2x16xf32>
    %78 = arith.addf %74, %77 : vector<2x16xf32>
    %c104 = arith.constant 104 : index
    %c0_36 = arith.constant 0 : index
    %79 = vector.load %arg1[%c104, %c0_36] : memref<632x128xbf16, #tpu.memory_space<vmem>>, vector<16x16xbf16>
    %80 = vector.extract_strided_slice %63 {offsets = [2, 0], sizes = [2, 16], strides = [1, 1]} : vector<18x16xbf16> to vector<2x16xbf16>
    %cst_37 = arith.constant dense<0.000000e+00> : vector<2x16xf32>
    %81 = tpu.matmul %80, %79, %cst_37 {dimension_numbers = #tpu.dot_dimension_numbers<[1], [0], [0], [1], [0, 0, 1, 1], [], []>} : vector<2x16xbf16>, vector<16x16xbf16>, vector<2x16xf32> -> vector<2x16xf32>
    %c120_38 = arith.constant 120 : index
    %c0_39 = arith.constant 0 : index
    %82 = vector.load %arg1[%c120_38, %c0_39] : memref<632x128xbf16, #tpu.memory_space<vmem>>, vector<16x16xbf16>
    %83 = vector.extract_strided_slice %63 {offsets = [4, 0], sizes = [2, 16], strides = [1, 1]} : vector<18x16xbf16> to vector<2x16xbf16>
    %cst_40 = arith.constant dense<0.000000e+00> : vector<2x16xf32>
    %84 = tpu.matmul %83, %82, %cst_40 {dimension_numbers = #tpu.dot_dimension_numbers<[1], [0], [0], [1], [0, 0, 1, 1], [], []>} : vector<2x16xbf16>, vector<16x16xbf16>, vector<2x16xf32> -> vector<2x16xf32>
    %85 = arith.addf %81, %84 : vector<2x16xf32>
    %c152 = arith.constant 152 : index
    %c0_41 = arith.constant 0 : index
    %86 = vector.load %arg1[%c152, %c0_41] : memref<632x128xbf16, #tpu.memory_space<vmem>>, vector<16x16xbf16>
    %87 = vector.extract_strided_slice %63 {offsets = [8, 0], sizes = [2, 16], strides = [1, 1]} : vector<18x16xbf16> to vector<2x16xbf16>
    %cst_42 = arith.constant dense<0.000000e+00> : vector<2x16xf32>
    %88 = tpu.matmul %87, %86, %cst_42 {dimension_numbers = #tpu.dot_dimension_numbers<[1], [0], [0], [1], [0, 0, 1, 1], [], []>} : vector<2x16xbf16>, vector<16x16xbf16>, vector<2x16xf32> -> vector<2x16xf32>
    %89 = arith.addf %85, %88 : vector<2x16xf32>
    %c168_43 = arith.constant 168 : index
    %c0_44 = arith.constant 0 : index
    %90 = vector.load %arg1[%c168_43, %c0_44] : memref<632x128xbf16, #tpu.memory_space<vmem>>, vector<16x16xbf16>
    %91 = vector.extract_strided_slice %63 {offsets = [10, 0], sizes = [2, 16], strides = [1, 1]} : vector<18x16xbf16> to vector<2x16xbf16>
    %cst_45 = arith.constant dense<0.000000e+00> : vector<2x16xf32>
    %92 = tpu.matmul %91, %90, %cst_45 {dimension_numbers = #tpu.dot_dimension_numbers<[1], [0], [0], [1], [0, 0, 1, 1], [], []>} : vector<2x16xbf16>, vector<16x16xbf16>, vector<2x16xf32> -> vector<2x16xf32>
    %93 = arith.addf %89, %92 : vector<2x16xf32>
    %c72 = arith.constant 72 : index
    %c0_46 = arith.constant 0 : index
    %94 = vector.load %arg1[%c72, %c0_46] : memref<632x128xbf16, #tpu.memory_space<vmem>>, vector<16x16xbf16>
    %95 = vector.extract_strided_slice %63 {offsets = [6, 0], sizes = [2, 16], strides = [1, 1]} : vector<18x16xbf16> to vector<2x16xbf16>
    %cst_47 = arith.constant dense<0.000000e+00> : vector<2x16xf32>
    %96 = tpu.matmul %95, %94, %cst_47 {dimension_numbers = #tpu.dot_dimension_numbers<[1], [0], [0], [1], [0, 0, 1, 1], [], []>} : vector<2x16xbf16>, vector<16x16xbf16>, vector<2x16xf32> -> vector<2x16xf32>
    %c88 = arith.constant 88 : index
    %c0_48 = arith.constant 0 : index
    %97 = vector.load %arg1[%c88, %c0_48] : memref<632x128xbf16, #tpu.memory_space<vmem>>, vector<16x16xbf16>
    %98 = vector.extract_strided_slice %63 {offsets = [8, 0], sizes = [2, 16], strides = [1, 1]} : vector<18x16xbf16> to vector<2x16xbf16>
    %cst_49 = arith.constant dense<0.000000e+00> : vector<2x16xf32>
    %99 = tpu.matmul %98, %97, %cst_49 {dimension_numbers = #tpu.dot_dimension_numbers<[1], [0], [0], [1], [0, 0, 1, 1], [], []>} : vector<2x16xbf16>, vector<16x16xbf16>, vector<2x16xf32> -> vector<2x16xf32>
    %100 = arith.addf %96, %99 : vector<2x16xf32>
    %c120_50 = arith.constant 120 : index
    %c0_51 = arith.constant 0 : index
    %101 = vector.load %arg1[%c120_50, %c0_51] : memref<632x128xbf16, #tpu.memory_space<vmem>>, vector<16x16xbf16>
    %102 = vector.extract_strided_slice %63 {offsets = [12, 0], sizes = [2, 16], strides = [1, 1]} : vector<18x16xbf16> to vector<2x16xbf16>
    %cst_52 = arith.constant dense<0.000000e+00> : vector<2x16xf32>
    %103 = tpu.matmul %102, %101, %cst_52 {dimension_numbers = #tpu.dot_dimension_numbers<[1], [0], [0], [1], [0, 0, 1, 1], [], []>} : vector<2x16xbf16>, vector<16x16xbf16>, vector<2x16xf32> -> vector<2x16xf32>
    %104 = arith.addf %100, %103 : vector<2x16xf32>
    %c136_53 = arith.constant 136 : index
    %c0_54 = arith.constant 0 : index
    %105 = vector.load %arg1[%c136_53, %c0_54] : memref<632x128xbf16, #tpu.memory_space<vmem>>, vector<16x16xbf16>
    %106 = vector.extract_strided_slice %63 {offsets = [14, 0], sizes = [2, 16], strides = [1, 1]} : vector<18x16xbf16> to vector<2x16xbf16>
    %cst_55 = arith.constant dense<0.000000e+00> : vector<2x16xf32>
    %107 = tpu.matmul %106, %105, %cst_55 {dimension_numbers = #tpu.dot_dimension_numbers<[1], [0], [0], [1], [0, 0, 1, 1], [], []>} : vector<2x16xbf16>, vector<16x16xbf16>, vector<2x16xf32> -> vector<2x16xf32>
    %108 = arith.addf %104, %107 : vector<2x16xf32>
    %c56 = arith.constant 56 : index
    %c0_56 = arith.constant 0 : index
    %109 = vector.load %arg1[%c56, %c0_56] : memref<632x128xbf16, #tpu.memory_space<vmem>>, vector<16x16xbf16>
    %110 = vector.extract_strided_slice %63 {offsets = [8, 0], sizes = [2, 16], strides = [1, 1]} : vector<18x16xbf16> to vector<2x16xbf16>
    %cst_57 = arith.constant dense<0.000000e+00> : vector<2x16xf32>
    %111 = tpu.matmul %110, %109, %cst_57 {dimension_numbers = #tpu.dot_dimension_numbers<[1], [0], [0], [1], [0, 0, 1, 1], [], []>} : vector<2x16xbf16>, vector<16x16xbf16>, vector<2x16xf32> -> vector<2x16xf32>
    %c72_58 = arith.constant 72 : index
    %c0_59 = arith.constant 0 : index
    %112 = vector.load %arg1[%c72_58, %c0_59] : memref<632x128xbf16, #tpu.memory_space<vmem>>, vector<16x16xbf16>
    %113 = vector.extract_strided_slice %63 {offsets = [10, 0], sizes = [2, 16], strides = [1, 1]} : vector<18x16xbf16> to vector<2x16xbf16>
    %cst_60 = arith.constant dense<0.000000e+00> : vector<2x16xf32>
    %114 = tpu.matmul %113, %112, %cst_60 {dimension_numbers = #tpu.dot_dimension_numbers<[1], [0], [0], [1], [0, 0, 1, 1], [], []>} : vector<2x16xbf16>, vector<16x16xbf16>, vector<2x16xf32> -> vector<2x16xf32>
    %115 = arith.addf %111, %114 : vector<2x16xf32>
    %c104_61 = arith.constant 104 : index
    %c0_62 = arith.constant 0 : index
    %116 = vector.load %arg1[%c104_61, %c0_62] : memref<632x128xbf16, #tpu.memory_space<vmem>>, vector<16x16xbf16>
    %117 = vector.extract_strided_slice %63 {offsets = [14, 0], sizes = [2, 16], strides = [1, 1]} : vector<18x16xbf16> to vector<2x16xbf16>
    %cst_63 = arith.constant dense<0.000000e+00> : vector<2x16xf32>
    %118 = tpu.matmul %117, %116, %cst_63 {dimension_numbers = #tpu.dot_dimension_numbers<[1], [0], [0], [1], [0, 0, 1, 1], [], []>} : vector<2x16xbf16>, vector<16x16xbf16>, vector<2x16xf32> -> vector<2x16xf32>
    %119 = arith.addf %115, %118 : vector<2x16xf32>
    %c120_64 = arith.constant 120 : index
    %c0_65 = arith.constant 0 : index
    %120 = vector.load %arg1[%c120_64, %c0_65] : memref<632x128xbf16, #tpu.memory_space<vmem>>, vector<16x16xbf16>
    %121 = vector.extract_strided_slice %63 {offsets = [16, 0], sizes = [2, 16], strides = [1, 1]} : vector<18x16xbf16> to vector<2x16xbf16>
    %cst_66 = arith.constant dense<0.000000e+00> : vector<2x16xf32>
    %122 = tpu.matmul %121, %120, %cst_66 {dimension_numbers = #tpu.dot_dimension_numbers<[1], [0], [0], [1], [0, 0, 1, 1], [], []>} : vector<2x16xbf16>, vector<16x16xbf16>, vector<2x16xf32> -> vector<2x16xf32>
    %123 = arith.addf %119, %122 : vector<2x16xf32>
    %124 = tpu.concatenate %78, %93, %108, %123 in 0 : vector<2x16xf32>, vector<2x16xf32>, vector<2x16xf32>, vector<2x16xf32> -> vector<8x16xf32>
    %c3 = arith.constant 3 : index
    %c0_67 = arith.constant 0 : index
    %125 = vector.load %arg2[%c3, %c0_67] : memref<16x128xf32, #tpu.memory_space<vmem>>, vector<1x16xf32>
    %126 = vector.broadcast %125 : vector<1x16xf32> to vector<8x16xf32>
    %127 = arith.addf %124, %126 : vector<8x16xf32>
    %128 = arith.truncf %127 : vector<8x16xf32> to vector<8x16xbf16>
    %c200 = arith.constant 200 : index
    %c0_68 = arith.constant 0 : index
    %129 = vector.load %arg1[%c200, %c0_68] : memref<632x128xbf16, #tpu.memory_space<vmem>>, vector<16x64xbf16>
    %cst_69 = arith.constant dense<0.000000e+00> : vector<8x64xf32>
    %130 = tpu.matmul %128, %129, %cst_69 {dimension_numbers = #tpu.dot_dimension_numbers<[1], [0], [0], [1], [0, 0, 1, 1], [], []>} : vector<8x16xbf16>, vector<16x64xbf16>, vector<8x64xf32> -> vector<8x64xf32>
    %c4 = arith.constant 4 : index
    %c0_70 = arith.constant 0 : index
    %131 = vector.load %arg2[%c4, %c0_70] : memref<16x128xf32, #tpu.memory_space<vmem>>, vector<1x64xf32>
    %132 = vector.broadcast %131 : vector<1x64xf32> to vector<8x64xf32>
    %133 = arith.addf %130, %132 : vector<8x64xf32>
    %cst_71 = arith.constant 0.000000e+00 : f32
    %134 = vector.broadcast %cst_71 : f32 to vector<8x64xf32>
    %135 = arith.maximumf %133, %134 : vector<8x64xf32>
    %136 = arith.truncf %135 : vector<8x64xf32> to vector<8x64xbf16>
    %c216 = arith.constant 216 : index
    %c0_72 = arith.constant 0 : index
    %137 = vector.load %arg1[%c216, %c0_72] : memref<632x128xbf16, #tpu.memory_space<vmem>>, vector<64x32xbf16>
    %cst_73 = arith.constant dense<0.000000e+00> : vector<8x32xf32>
    %138 = tpu.matmul %136, %137, %cst_73 {dimension_numbers = #tpu.dot_dimension_numbers<[1], [0], [0], [1], [0, 0, 1, 1], [], []>} : vector<8x64xbf16>, vector<64x32xbf16>, vector<8x32xf32> -> vector<8x32xf32>
    %c5 = arith.constant 5 : index
    %c0_74 = arith.constant 0 : index
    %139 = vector.load %arg2[%c5, %c0_74] : memref<16x128xf32, #tpu.memory_space<vmem>>, vector<1x32xf32>
    %140 = vector.broadcast %139 : vector<1x32xf32> to vector<8x32xf32>
    %141 = arith.addf %138, %140 : vector<8x32xf32>
    %cst_75 = arith.constant 0.000000e+00 : f32
    %142 = vector.broadcast %cst_75 : f32 to vector<8x32xf32>
    %143 = arith.maximumf %141, %142 : vector<8x32xf32>
    %144 = arith.truncf %143 : vector<8x32xf32> to vector<8x32xbf16>
    %c280 = arith.constant 280 : index
    %c0_76 = arith.constant 0 : index
    %145 = vector.load %arg1[%c280, %c0_76] : memref<632x128xbf16, #tpu.memory_space<vmem>>, vector<32x32xbf16>
    %146 = vector.extract_strided_slice %144 {offsets = [0, 0], sizes = [2, 32], strides = [1, 1]} : vector<8x32xbf16> to vector<2x32xbf16>
    %cst_77 = arith.constant dense<0.000000e+00> : vector<2x32xf32>
    %147 = tpu.matmul %146, %145, %cst_77 {dimension_numbers = #tpu.dot_dimension_numbers<[1], [0], [0], [1], [0, 0, 1, 1], [], []>} : vector<2x32xbf16>, vector<32x32xbf16>, vector<2x32xf32> -> vector<2x32xf32>
    %c312 = arith.constant 312 : index
    %c0_78 = arith.constant 0 : index
    %148 = vector.load %arg1[%c312, %c0_78] : memref<632x128xbf16, #tpu.memory_space<vmem>>, vector<32x32xbf16>
    %149 = vector.extract_strided_slice %144 {offsets = [2, 0], sizes = [2, 32], strides = [1, 1]} : vector<8x32xbf16> to vector<2x32xbf16>
    %cst_79 = arith.constant dense<0.000000e+00> : vector<2x32xf32>
    %150 = tpu.matmul %149, %148, %cst_79 {dimension_numbers = #tpu.dot_dimension_numbers<[1], [0], [0], [1], [0, 0, 1, 1], [], []>} : vector<2x32xbf16>, vector<32x32xbf16>, vector<2x32xf32> -> vector<2x32xf32>
    %151 = arith.addf %147, %150 : vector<2x32xf32>
    %c344 = arith.constant 344 : index
    %c0_80 = arith.constant 0 : index
    %152 = vector.load %arg1[%c344, %c0_80] : memref<632x128xbf16, #tpu.memory_space<vmem>>, vector<32x32xbf16>
    %153 = vector.extract_strided_slice %144 {offsets = [4, 0], sizes = [2, 32], strides = [1, 1]} : vector<8x32xbf16> to vector<2x32xbf16>
    %cst_81 = arith.constant dense<0.000000e+00> : vector<2x32xf32>
    %154 = tpu.matmul %153, %152, %cst_81 {dimension_numbers = #tpu.dot_dimension_numbers<[1], [0], [0], [1], [0, 0, 1, 1], [], []>} : vector<2x32xbf16>, vector<32x32xbf16>, vector<2x32xf32> -> vector<2x32xf32>
    %155 = arith.addf %151, %154 : vector<2x32xf32>
    %c376 = arith.constant 376 : index
    %c0_82 = arith.constant 0 : index
    %156 = vector.load %arg1[%c376, %c0_82] : memref<632x128xbf16, #tpu.memory_space<vmem>>, vector<32x32xbf16>
    %157 = vector.extract_strided_slice %144 {offsets = [6, 0], sizes = [2, 32], strides = [1, 1]} : vector<8x32xbf16> to vector<2x32xbf16>
    %cst_83 = arith.constant dense<0.000000e+00> : vector<2x32xf32>
    %158 = tpu.matmul %157, %156, %cst_83 {dimension_numbers = #tpu.dot_dimension_numbers<[1], [0], [0], [1], [0, 0, 1, 1], [], []>} : vector<2x32xbf16>, vector<32x32xbf16>, vector<2x32xf32> -> vector<2x32xf32>
    %159 = arith.addf %155, %158 : vector<2x32xf32>
    %c6 = arith.constant 6 : index
    %c0_84 = arith.constant 0 : index
    %160 = vector.load %arg2[%c6, %c0_84] : memref<16x128xf32, #tpu.memory_space<vmem>>, vector<1x32xf32>
    %161 = vector.broadcast %160 : vector<1x32xf32> to vector<2x32xf32>
    %162 = arith.addf %159, %161 : vector<2x32xf32>
    %163 = arith.truncf %162 : vector<2x32xf32> to vector<2x32xbf16>
    %c408 = arith.constant 408 : index
    %c0_85 = arith.constant 0 : index
    %164 = vector.load %arg1[%c408, %c0_85] : memref<632x128xbf16, #tpu.memory_space<vmem>>, vector<32x128xbf16>
    %cst_86 = arith.constant dense<0.000000e+00> : vector<2x128xf32>
    %165 = tpu.matmul %163, %164, %cst_86 {dimension_numbers = #tpu.dot_dimension_numbers<[1], [0], [0], [1], [0, 0, 1, 1], [], []>} : vector<2x32xbf16>, vector<32x128xbf16>, vector<2x128xf32> -> vector<2x128xf32>
    %c7 = arith.constant 7 : index
    %c0_87 = arith.constant 0 : index
    %166 = vector.load %arg2[%c7, %c0_87] : memref<16x128xf32, #tpu.memory_space<vmem>>, vector<1x128xf32>
    %167 = vector.broadcast %166 : vector<1x128xf32> to vector<2x128xf32>
    %168 = arith.addf %165, %167 : vector<2x128xf32>
    %cst_88 = arith.constant 0.000000e+00 : f32
    %169 = vector.broadcast %cst_88 : f32 to vector<2x128xf32>
    %170 = arith.maximumf %168, %169 : vector<2x128xf32>
    %171 = arith.truncf %170 : vector<2x128xf32> to vector<2x128xbf16>
    %c440 = arith.constant 440 : index
    %c0_89 = arith.constant 0 : index
    %172 = vector.load %arg1[%c440, %c0_89] : memref<632x128xbf16, #tpu.memory_space<vmem>>, vector<128x32xbf16>
    %cst_90 = arith.constant dense<0.000000e+00> : vector<2x32xf32>
    %173 = tpu.matmul %171, %172, %cst_90 {dimension_numbers = #tpu.dot_dimension_numbers<[1], [0], [0], [1], [0, 0, 1, 1], [], []>} : vector<2x128xbf16>, vector<128x32xbf16>, vector<2x32xf32> -> vector<2x32xf32>
    %c8 = arith.constant 8 : index
    %c0_91 = arith.constant 0 : index
    %174 = vector.load %arg2[%c8, %c0_91] : memref<16x128xf32, #tpu.memory_space<vmem>>, vector<1x32xf32>
    %175 = vector.broadcast %174 : vector<1x32xf32> to vector<2x32xf32>
    %176 = arith.addf %173, %175 : vector<2x32xf32>
    %cst_92 = arith.constant 0.000000e+00 : f32
    %177 = vector.broadcast %cst_92 : f32 to vector<2x32xf32>
    %178 = arith.maximumf %176, %177 : vector<2x32xf32>
    %179 = arith.truncf %178 : vector<2x32xf32> to vector<2x32xbf16>
    %c568 = arith.constant 568 : index
    %c0_93 = arith.constant 0 : index
    %180 = vector.load %arg1[%c568, %c0_93] : memref<632x128xbf16, #tpu.memory_space<vmem>>, vector<32x32xbf16>
    %cst_94 = arith.constant dense<0.000000e+00> : vector<2x32xf32>
    %181 = tpu.matmul %179, %180, %cst_94 {dimension_numbers = #tpu.dot_dimension_numbers<[1], [0], [0], [1], [0, 0, 1, 1], [], []>} : vector<2x32xbf16>, vector<32x32xbf16>, vector<2x32xf32> -> vector<2x32xf32>
    %c9 = arith.constant 9 : index
    %c0_95 = arith.constant 0 : index
    %182 = vector.load %arg2[%c9, %c0_95] : memref<16x128xf32, #tpu.memory_space<vmem>>, vector<1x32xf32>
    %183 = vector.broadcast %182 : vector<1x32xf32> to vector<2x32xf32>
    %184 = arith.addf %181, %183 : vector<2x32xf32>
    %185 = arith.truncf %184 : vector<2x32xf32> to vector<2x32xbf16>
    %c600 = arith.constant 600 : index
    %c0_96 = arith.constant 0 : index
    %186 = vector.load %arg1[%c600, %c0_96] : memref<632x128xbf16, #tpu.memory_space<vmem>>, vector<32x128xbf16>
    %cst_97 = arith.constant dense<0.000000e+00> : vector<2x128xf32>
    %187 = tpu.matmul %185, %186, %cst_97 {dimension_numbers = #tpu.dot_dimension_numbers<[1], [0], [0], [1], [0, 0, 1, 1], [], []>} : vector<2x32xbf16>, vector<32x128xbf16>, vector<2x128xf32> -> vector<2x128xf32>
    %c10 = arith.constant 10 : index
    %c0_98 = arith.constant 0 : index
    %188 = vector.load %arg2[%c10, %c0_98] : memref<16x128xf32, #tpu.memory_space<vmem>>, vector<1x128xf32>
    %189 = vector.broadcast %188 : vector<1x128xf32> to vector<2x128xf32>
    %190 = arith.addf %187, %189 : vector<2x128xf32>
    %cst_99 = arith.constant 0.000000e+00 : f32
    %191 = vector.broadcast %cst_99 : f32 to vector<2x128xf32>
    %192 = arith.maximumf %190, %191 : vector<2x128xf32>
    %193 = tpu.concatenate %170, %192 in 0 : vector<2x128xf32>, vector<2x128xf32> -> vector<4x128xf32>
    %c0_100 = arith.constant 0 : index
    %c0_101 = arith.constant 0 : index
    %194 = vector.load %arg3[%c0_100, %c0_101] : memref<4x128xf32, #tpu.memory_space<vmem>>, vector<4x128xf32>
    tpu.vector_store %arg3[%c0_100, %c0_101], %193 {strides = array<i32>} : memref<4x128xf32, #tpu.memory_space<vmem>>, vector<4x128xf32>,
    return
  }
}

</mosaic_0001>

<bundles_post_ra>
// kernel: wechat_forward.1
= control target key start
LH: loop header
LB: loop body
LE: loop exit
PB: predicated region body
PF: predicated region fallthrough
CT: control target
= control target key end

     0   :  { %vm111_vm0 = vcmask 1044480   ;;  %vm112_vm1 = vcmask 1045504   ;;  %vm86_vm2 = vcmask 220160   ;;  %v2656_v1 = vmov 65535   ;;  %s3211_s1 = inlined_call_operand.vmem [shape: bf16[632,128], index: 1, kind: input, shape index: {}]   ;;  %s3212_s0 = inlined_call_operand.vmem [shape: bf16[128,27], index: 0, kind: input, shape index: {}]   ;;  %s3213_s2 = inlined_call_operand.vmem [shape: f32[16,128], index: 2, kind: input, shape index: {}]   ;;  %s3214_s3 = inlined_call_operand.vmem [shape: f32[4,128], index: 3, kind: output, shape index: {}]  }
   0x1   :  { %v2606_v0 = vld [vmem:[%s3211_s1] sm:$0xff]   ;;  %v113_v2 = vsel %vm111_vm0, 4294967295, %v2656_v1  ;;  %v2607_v3 = vld [vmem:[%s3211_s1 + $0x8] sm:$0x3f]   ;;  %v2610_v8 = vld [vmem:[%s3212_s0 + $0x10] sm:$0xff]   ;;  %vm215_vm3 = vcmask 195584  }
   0x2   :  { %2336 = vmatprep.subr.bf16.mxu0 %v2606_v0  ;;  %v114_v4 = vsel %vm112_vm1, %v113_v2, 0  ;;  %v2608_v5 = vld [vmem:[%s3212_s0] sm:$0xff]   ;;  %v2609_v7 = vld [vmem:[%s3212_s0 + $0x8] sm:$0xff]   ;;  %v2611_v9 = vld [vmem:[%s3212_s0 + $0x18] sm:$0xff]   ;;  %vm590_vm4 = vcmask 1043456   ;;  %vm419_vm5 = vcmask 190464  }
   0x3   :  { %2337 = vmatpush3.bf16.msra.mxu0 %v2606_v0  ;;  %v116_v6 = vand.u32 %v2607_v3, %v114_v4  ;;  %2340 = vmatprep.mubr.msk.bf16.mxu0 %vm86_vm2, %v2608_v5  ;;  %v2612_v10 = vld [vmem:[%s3212_s0 + $0x20] sm:$0xff]   ;;  %v2613_v11 = vld [vmem:[%s3212_s0 + $0x28] sm:$0xff]   ;;  %v2614_v12 = vld [vmem:[%s3212_s0 + $0x30] sm:$0xff]   ;;  %vm449_vm6 = vcmask 194564   ;;  %vm434_vm7 = vcmask 192514   ;;  %vm550_vm8 = vcmask 1041409  }
   0x4   :  { %v2615_v13 = vld [vmem:[%s3212_s0 + $0x38] sm:$0xff]   ;;  %v2616_v18 = vld [vmem:[%s3211_s1 + $0x10] sm:$0xff]   ;;  %vm555_vm9 = vcmask 1043459   ;;  %vm560_vm10 = vcmask 1045509   ;;  %vm565_vm11 = vcmask 1047559   ;;  %vm588_vm12 = vcmask 1041408  }
   0x5   :  { %2338 = vmatprep.subr.bf16.mxu0 %v116_v6  ;;  %v2617_v19 = vld [vmem:[%s3211_s1 + $0x18] ss:$0 sps:$4 sm:$0xff]   ;;  %2356 = vmatprep.subr.bf16.mxu1 %v2616_v18  ;;  %vm2658_vm13 = vmmov 0   ;;  %vm689_vm14 = vcmask 130048   ;;  %vm1547_vm15 = vcmask 523264   ;;  %vm1615_vm0 = vcmask 261120  }
   0x6   :  { %2357 = vmatpush3.bf16.msra.mxu1 %v2616_v18  ;;  %v622_v25 = vsel %vm590_vm4, %v2617_v19, 0 }
   0x7   :  { %2339 = vmatpush3.bf16.msra.mxu0 %v116_v6  ;;  %2602 = vmatprep.subr.msk.bf16.mxu1 %vm590_vm4, %v2617_v19 }
   0xa   :  { %2341 = vmatmul.mubr.msk.bf16.vlgmr.msra.gmra.mrb[0].mxu0 %vm86_vm2, %v2609_v7  ;;  %2359 = vmatpush3.bf16.msra.mxu1 %v622_v25 }
   0xb   :  { %2344 = vmatprep.mubr.msk.bf16.mxu0 %vm86_vm2, %v2610_v8 }
  0x12   :  { %2345 = vmatmul.mubr.msk.bf16.gmra.mrb[4].mxu0 %vm86_vm2, %v2611_v9 }
  0x13   :  { %2348 = vmatprep.mubr.msk.bf16.mxu0 %vm86_vm2, %v2612_v10 }
  0x1a   :  { %2349 = vmatmul.mubr.msk.bf16.gmra.mrb[8].mxu0 %vm86_vm2, %v2613_v11 }
  0x1b   :  { %2352 = vmatprep.mubr.msk.bf16.mxu0 %vm86_vm2, %v2614_v12 }
  0x22   :  { %2353 = vmatmul.mubr.msk.bf16.gmra.mrb[12].mxu0 %vm86_vm2, %v2615_v13 }
  0xdd   :  { %v2718_v14 = vpop.f32.mrb[0].mxu0 }
  0xde   :  { %v152_v15 = vpop.f32.mrb[1].mxu0  ;;  %v219_v23 = vsel %vm215_vm3, %v2718_v14, 0.0 }
  0xdf   :  { %v2720_v16 = vpop.f32.mrb[2].mxu0  ;;  %v216_v20 = vsel %vm215_vm3, %v152_v15, 0.0 }
  0xe0   :  { %v155_v17 = vpop.f32.mrb[3].mxu0  ;;  %v221_v26 = vsel %vm215_vm3, %v2720_v16, 0.0 }
  0xe1   :  { %v217_v21 = vsel %vm215_vm3, %v155_v17, 0.0 }
  0xe2   :  { %v218_v22 = vadd.f32 %v217_v21, %v216_v20 }
  0xe4   :  { %v220_v24 = vadd.f32 %v219_v23, %v218_v22 }
  0xe5   :  { %v2346_v27 = vpop.f32.mrb[4].mxu0 }
  0xe6   :  { %v168_v28 = vpop.f32.mrb[5].mxu0  ;;  %v222_v29 = vadd.f32 %v221_v26, %v220_v24  ;;  %v227_v36 = vsel %vm215_vm3, %v2346_v27, 0.0 }
  0xe7   :  { %v223_v30 = vsel %vm215_vm3, %v168_v28, 0.0  ;;  %v2347_v31 = vpop.f32.mrb[6].mxu0 }
  0xe8   :  { %v224_v32 = vadd.f32 %v223_v30, %v222_v29  ;;  %v171_v33 = vpop.f32.mrb[7].mxu0  ;;  %v229_v38 = vsel %vm215_vm3, %v2347_v31, 0.0 }
  0xe9   :  { %v225_v34 = vsel %vm215_vm3, %v171_v33, 0.0 }
  0xea   :  { %v226_v35 = vadd.f32 %v225_v34, %v224_v32  ;;  %v2794_v32 = vld [vmem:[%s3211_s1 + $0x3c] sm:$0xff]  }
  0xec   :  { %v228_v37 = vadd.f32 %v227_v36, %v226_v35 }
  0xed   :  { %v2350_v39 = vpop.f32.mrb[8].mxu0 }
  0xee   :  { %v184_v40 = vpop.f32.mrb[9].mxu0  ;;  %v230_v41 = vadd.f32 %v229_v38, %v228_v37  ;;  %v235_v48 = vsel %vm215_vm3, %v2350_v39, 0.0  ;;  %v2657_v37 = vmov 0.0  }
  0xef   :  { %v231_v42 = vsel %vm215_vm3, %v184_v40, 0.0  ;;  %v2351_v43 = vpop.f32.mrb[10].mxu0  ;;  %2388 = vmatprep.subr.bf16.mxu0 %v2657_v37  ;;  %2364 = vmatprep.subr.bf16.mxu1 %v2657_v37 }
  0xf0   :  { %v232_v44 = vadd.f32 %v231_v42, %v230_v41  ;;  %v187_v45 = vpop.f32.mrb[11].mxu0  ;;  %v237_v50 = vsel %vm215_vm3, %v2351_v43, 0.0  ;;  %2389 = vmatpush3.bf16.msra.mxu0 %v2794_v32  ;;  %2390 = vmatprep.mubr.msk.bf16.mxu0 %vm2658_vm13, %v2657_v37 }
  0xf1   :  { %v233_v46 = vsel %vm215_vm3, %v187_v45, 0.0  ;;  %2394 = vmatprep.subr.bf16.mxu0 %v2657_v37 }
  0xf2   :  { %v234_v47 = vadd.f32 %v233_v46, %v232_v44 }
  0xf4   :  { %v236_v49 = vadd.f32 %v235_v48, %v234_v47 }
  0xf5   :  { %v2354_v51 = vpop.f32.mrb[12].mxu0 }
  0xf6   :  { %v200_v52 = vpop.f32.mrb[13].mxu0  ;;  %v238_v53 = vadd.f32 %v237_v50, %v236_v49  ;;  %v243_v60 = vsel %vm215_vm3, %v2354_v51, 0.0 }
  0xf7   :  { %v239_v54 = vsel %vm215_vm3, %v200_v52, 0.0  ;;  %v2355_v55 = vpop.f32.mrb[14].mxu0 }
  0xf8   :  { %v240_v56 = vadd.f32 %v239_v54, %v238_v53  ;;  %v203_v57 = vpop.f32.mrb[15].mxu0  ;;  %v245_v62 = vsel %vm215_vm3, %v2355_v55, 0.0 }
  0xf9   :  { %v241_v58 = vsel %vm215_vm3, %v203_v57, 0.0 }
  0xfa   :  { %v242_v59 = vadd.f32 %v241_v58, %v240_v56 }
  0xfc   :  { %v244_v61 = vadd.f32 %v243_v60, %v242_v59 }
  0xfe   :  { %v246_v63 = vadd.f32 %v245_v62, %v244_v61 }
 0x100   :  { %v247_v0 = vrot.slane %v246_v63, 4 }
 0x102   :  { %v248_v1 = vadd.f32 %v247_v0, %v246_v63 }
 0x104   :  { %v249_v2 = vrot.slane %v248_v1, 2 }
 0x106   :  { %v250_v3 = vadd.f32 %v249_v2, %v248_v1 }
 0x108   :  { %v251_v4 = vrot.slane %v250_v3, 1 }
 0x10a   :  { %v252_v5 = vadd.f32 %v251_v4, %v250_v3 }
 0x10c   :  { %v254_v6 = vmul.f32 0.0078125, %v252_v5 }
 0x10e   :  { %v2748_v7 = vsub.f32 %v152_v15, %v254_v6  ;;  %v2750_v8 = vsub.f32 %v155_v17, %v254_v6  ;;  %v2753_v9 = vsub.f32 %v2718_v14, %v254_v6  ;;  %v2756_v10 = vsub.f32 %v2720_v16, %v254_v6 }
 0x10f   :  { %v2758_v11 = vsub.f32 %v168_v28, %v254_v6  ;;  %v2760_v12 = vsub.f32 %v171_v33, %v254_v6  ;;  %v2762_v13 = vsub.f32 %v2346_v27, %v254_v6  ;;  %v262_v18 = vsub.f32 %v2347_v31, %v254_v6 }
 0x110   :  { %v2764_v19 = vsub.f32 %v184_v40, %v254_v6  ;;  %v2766_v20 = vsub.f32 %v187_v45, %v254_v6  ;;  %v2768_v15 = vsub.f32 %v2350_v39, %v254_v6  ;;  %v2770_v17 = vsub.f32 %v2351_v43, %v254_v6 }
 0x111   :  { %v2772_v14 = vsub.f32 %v200_v52, %v254_v6  ;;  %v2774_v21 = vsub.f32 %v203_v57, %v254_v6  ;;  %v2776_v16 = vsub.f32 %v2354_v51, %v254_v6  ;;  %v270_v22 = vsub.f32 %v2355_v55, %v254_v6 }
 0x112   :  { %v271_v23 = vmul.f32 %v2748_v7, %v2748_v7  ;;  %v272_v24 = vmul.f32 %v2750_v8, %v2750_v8  ;;  %v273_v25 = vmul.f32 %v2753_v9, %v2753_v9  ;;  %v274_v26 = vmul.f32 %v2756_v10, %v2756_v10 }
 0x113   :  { %v275_v30 = vmul.f32 %v2758_v11, %v2758_v11  ;;  %v276_v34 = vmul.f32 %v2760_v12, %v2760_v12  ;;  %v277_v38 = vmul.f32 %v2762_v13, %v2762_v13  ;;  %v278_v41 = vmul.f32 %v262_v18, %v262_v18 }
 0x114   :  { %v287_v27 = vsel %vm215_vm3, %v271_v23, 0.0  ;;  %v288_v28 = vsel %vm215_vm3, %v272_v24, 0.0  ;;  %v290_v31 = vsel %vm215_vm3, %v273_v25, 0.0  ;;  %v292_v35 = vsel %vm215_vm3, %v274_v26, 0.0 }
 0x115   :  { %v289_v29 = vadd.f32 %v288_v28, %v287_v27  ;;  %v294_v39 = vsel %vm215_vm3, %v275_v30, 0.0  ;;  %v296_v42 = vsel %vm215_vm3, %v276_v34, 0.0  ;;  %v279_v44 = vmul.f32 %v2764_v19, %v2764_v19 }
 0x116   :  { %v298_v45 = vsel %vm215_vm3, %v277_v38, 0.0  ;;  %v280_v47 = vmul.f32 %v2766_v20, %v2766_v20  ;;  %v300_v48 = vsel %vm215_vm3, %v278_v41, 0.0  ;;  %v281_v50 = vmul.f32 %v2768_v15, %v2768_v15 }
 0x117   :  { %v291_v33 = vadd.f32 %v290_v31, %v289_v29  ;;  %v302_v51 = vsel %vm215_vm3, %v279_v44, 0.0  ;;  %v282_v53 = vmul.f32 %v2770_v17, %v2770_v17  ;;  %v283_v56 = vmul.f32 %v2772_v14, %v2772_v14 }
 0x118   :  { %v304_v54 = vsel %vm215_vm3, %v280_v47, 0.0  ;;  %v306_v57 = vsel %vm215_vm3, %v281_v50, 0.0  ;;  %v284_v59 = vmul.f32 %v2774_v21, %v2774_v21  ;;  %v285_v62 = vmul.f32 %v2776_v16, %v2776_v16 }
 0x119   :  { %v293_v36 = vadd.f32 %v292_v35, %v291_v33  ;;  %v308_v60 = vsel %vm215_vm3, %v282_v53, 0.0  ;;  %v310_v63 = vsel %vm215_vm3, %v283_v56, 0.0  ;;  %v286_v1 = vmul.f32 %v270_v22, %v270_v22  ;;  %v2177_v22 = vld [vmem:[%s3213_s2] ss:$0 sm:$0xff] }
 0x11a   :  { %v312_v2 = vsel %vm215_vm3, %v284_v59, 0.0  ;;  %v314_v4 = vsel %vm215_vm3, %v285_v62, 0.0 }
 0x11b   :  { %v295_v40 = vadd.f32 %v294_v39, %v293_v36  ;;  %v316_v6 = vsel %vm215_vm3, %v286_v1, 0.0 }
 0x11d   :  { %v297_v43 = vadd.f32 %v296_v42, %v295_v40  ;;  %v2178_v42 = vld [vmem:[%s3213_s2 + $0x1] ss:$0 sm:$0xff] }
 0x11f   :  { %v299_v46 = vadd.f32 %v298_v45, %v297_v43 }
 0x121   :  { %v301_v49 = vadd.f32 %v300_v48, %v299_v46 }
 0x123   :  { %v303_v52 = vadd.f32 %v302_v51, %v301_v49 }
 0x125   :  { %v305_v55 = vadd.f32 %v304_v54, %v303_v52 }
 0x127   :  { %v307_v58 = vadd.f32 %v306_v57, %v305_v55 }
 0x129   :  { %v309_v61 = vadd.f32 %v308_v60, %v307_v58 }
 0x12b   :  { %v311_v0 = vadd.f32 %v310_v63, %v309_v61 }
 0x12d   :  { %v313_v3 = vadd.f32 %v312_v2, %v311_v0 }
 0x12f   :  { %v315_v5 = vadd.f32 %v314_v4, %v313_v3 }
 0x131   :  { %v317_v18 = vadd.f32 %v316_v6, %v315_v5 }
 0x133   :  { %v318_v23 = vrot.slane %v317_v18, 4 }
 0x135   :  { %v319_v24 = vadd.f32 %v318_v23, %v317_v18 }
 0x137   :  { %v320_v25 = vrot.slane %v319_v24, 2 }
 0x139   :  { %v321_v26 = vadd.f32 %v320_v25, %v319_v24 }
 0x13b   :  { %v322_v27 = vrot.slane %v321_v26, 1 }
 0x13d   :  { %v323_v28 = vadd.f32 %v322_v27, %v321_v26 }
 0x13f   :  { %v324_v29 = vmul.f32 0.0078125, %v323_v28 }
 0x141   :  { %v325_v30 = vadd.f32 1e-05, %v324_v29 }
 0x143   :  { %2654 = vrsqrt.f32 %v325_v30 }
 0x14d   :  { %v2655_v31 = vpop.eup %2654 }
 0x14e   :  { %v333_v33 = vmul.f32 %v2655_v31, %v2762_v13  ;;  %v334_v34 = vmul.f32 %v2655_v31, %v2764_v19  ;;  %v335_v35 = vmul.f32 %v2655_v31, %v2766_v20  ;;  %v336_v36 = vmul.f32 %v2655_v31, %v2768_v15 }
 0x14f   :  { %v337_v38 = vmul.f32 %v2655_v31, %v2770_v17  ;;  %v338_v39 = vmul.f32 %v2655_v31, %v2772_v14  ;;  %v339_v40 = vmul.f32 %v2655_v31, %v2774_v21  ;;  %v340_v41 = vmul.f32 %v2655_v31, %v2776_v16 }
 0x150   :  { %v353_v43 = vmul.f32 %v2177_v22, %v334_v34  ;;  %v354_v13 = vmul.f32 %v2177_v22, %v335_v35  ;;  %v355_v44 = vmul.f32 %v2177_v22, %v336_v36  ;;  %v327_v19 = vmul.f32 %v2655_v31, %v2748_v7 }
 0x151   :  { %v356_v20 = vmul.f32 %v2177_v22, %v337_v38  ;;  %v357_v45 = vmul.f32 %v2177_v22, %v338_v39  ;;  %v358_v15 = vmul.f32 %v2177_v22, %v339_v40  ;;  %v359_v46 = vmul.f32 %v2177_v22, %v340_v41 }
 0x152   :  { %v372_v17 = vadd.f32 %v2178_v42, %v353_v43  ;;  %v373_v47 = vadd.f32 %v2178_v42, %v354_v13  ;;  %v374_v14 = vadd.f32 %v2178_v42, %v355_v44  ;;  %v328_v21 = vmul.f32 %v2655_v31, %v2750_v8 }
 0x153   :  { %v375_v16 = vadd.f32 %v2178_v42, %v356_v20  ;;  %v376_v48 = vadd.f32 %v2178_v42, %v357_v45  ;;  %v377_v49 = vadd.f32 %v2178_v42, %v358_v15  ;;  %v378_v50 = vadd.f32 %v2178_v42, %v359_v46 }
 0x154   :  { %v386_v51 = vmax.f32 %v372_v17, 0.0  ;;  %v387_v52 = vmax.f32 %v373_v47, 0.0  ;;  %v388_v53 = vmax.f32 %v374_v14, 0.0  ;;  %v329_v7 = vmul.f32 %v2655_v31, %v2753_v9 }
 0x155   :  { %v389_v54 = vmax.f32 %v375_v16, 0.0  ;;  %v390_v55 = vmax.f32 %v376_v48, 0.0  ;;  %v391_v56 = vmax.f32 %v377_v49, 0.0  ;;  %v392_v57 = vmax.f32 %v378_v50, 0.0 }
 0x156   :  { %v398_v58 = vsel %vm215_vm3, %v386_v51, -inf  ;;  %v399_v59 = vsel %vm215_vm3, %v387_v52, -inf  ;;  %v400_v60 = vsel %vm215_vm3, %v388_v53, -inf  ;;  %v330_v8 = vmul.f32 %v2655_v31, %v2756_v10 }
 0x157   :  { %v401_v61 = vmax.f32 %v398_v58, %v400_v60  ;;  %v407_v62 = vsel %vm215_vm3, %v389_v54, -inf  ;;  %v408_v63 = vsel %vm215_vm3, %v390_v55, -inf  ;;  %v415_v0 = vsel %vm215_vm3, %v391_v56, -inf }
 0x158   :  { %v409_v9 = vmax.f32 %v400_v60, %v408_v63  ;;  %v416_v1 = vsel %vm215_vm3, %v392_v57, -inf  ;;  %v331_v2 = vmul.f32 %v2655_v31, %v2758_v11  ;;  %v332_v3 = vmul.f32 %v2655_v31, %v2760_v12 }
 0x159   :  { %v402_v4 = vmax.f32 %v401_v61, %v399_v59  ;;  %v417_v5 = vmax.f32 %v408_v63, %v416_v1  ;;  %v346_v6 = vmul.f32 %v2177_v22, %v327_v19  ;;  %v347_v18 = vmul.f32 %v2177_v22, %v328_v21 }
 0x15a   :  { %v2858_v10 = vmax.f32 %v409_v9, %v407_v62  ;;  %v348_v23 = vmul.f32 %v2177_v22, %v329_v7  ;;  %v349_v24 = vmul.f32 %v2177_v22, %v330_v8  ;;  %v350_v25 = vmul.f32 %v2177_v22, %v331_v2 }
 0x15b   :  { %v2860_v26 = vmax.f32 %v417_v5, %v415_v0  ;;  %v351_v27 = vmul.f32 %v2177_v22, %v332_v3  ;;  %v352_v28 = vmul.f32 %v2177_v22, %v333_v33  ;;  %v365_v29 = vadd.f32 %v2178_v42, %v346_v6 }
 0x15c   :  { %v366_v30 = vadd.f32 %v2178_v42, %v347_v18  ;;  %v367_v34 = vadd.f32 %v2178_v42, %v348_v23  ;;  %v368_v11 = vadd.f32 %v2178_v42, %v349_v24  ;;  %v369_v35 = vadd.f32 %v2178_v42, %v350_v25 }
 0x15d   :  { %v2864_v12 = vsel %vm419_vm5, %v2860_v26, -inf  ;;  %v2868_v31 = vsel %vm449_vm6, %v2860_v26, -inf  ;;  %v370_v36 = vadd.f32 %v2178_v42, %v351_v27  ;;  %v371_v38 = vadd.f32 %v2178_v42, %v352_v28 }
 0x15e   :  { %v514_v39 = vrot.slane %v2864_v12, 4  ;;  %v542_v40 = vrot.slane %v2868_v31, 4  ;;  %v379_v22 = vmax.f32 %v365_v29, 0.0  ;;  %v380_v33 = vmax.f32 %v366_v30, 0.0 }
 0x15f   :  { %v381_v41 = vmax.f32 %v367_v34, 0.0  ;;  %v382_v43 = vmax.f32 %v368_v11, 0.0  ;;  %v383_v13 = vmax.f32 %v369_v35, 0.0  ;;  %v384_v44 = vmax.f32 %v370_v36, 0.0 }
 0x160   :  { %v385_v19 = vmax.f32 %v371_v38, 0.0  ;;  %v393_v20 = vsel %vm215_vm3, %v379_v22, -inf  ;;  %v394_v45 = vsel %vm215_vm3, %v380_v33, -inf  ;;  %v427_v15 = vsel %vm419_vm5, %v402_v4, -inf }
 0x161   :  { %v395_v46 = vsel %vm215_vm3, %v381_v41, -inf  ;;  %v403_v42 = vsel %vm215_vm3, %v382_v43, -inf  ;;  %v404_v17 = vsel %vm215_vm3, %v383_v13, -inf  ;;  %v411_v47 = vsel %vm215_vm3, %v384_v44, -inf }
 0x162   :  { %v396_v14 = vmax.f32 %v393_v20, %v395_v46  ;;  %v405_v21 = vmax.f32 %v395_v46, %v404_v17  ;;  %v412_v16 = vsel %vm215_vm3, %v385_v19, -inf  ;;  %v428_v48 = vrot.slane %v427_v15, 4 }
 0x163   :  { %v413_v49 = vmax.f32 %v404_v17, %v412_v16  ;;  %v442_v50 = vsel %vm434_vm7, %v402_v4, -inf  ;;  %v457_v51 = vsel %vm449_vm6, %v402_v4, -inf  ;;  %v471_v52 = vsel %vm419_vm5, %v2858_v10, -inf }
 0x164   :  { %v397_v53 = vmax.f32 %v396_v14, %v394_v45  ;;  %v406_v7 = vmax.f32 %v405_v21, %v403_v42  ;;  %v429_v54 = vmax.f32 %v427_v15, %v428_v48  ;;  %v443_v55 = vrot.slane %v442_v50, 4 }
 0x165   :  { %v2884_v56 = vmax.f32 %v413_v49, %v411_v47  ;;  %v458_v57 = vrot.slane %v457_v51, 4  ;;  %v472_v58 = vrot.slane %v471_v52, 4  ;;  %v485_v59 = vsel %vm434_vm7, %v2858_v10, -inf }
 0x166   :  { %v420_v60 = vsel %vm419_vm5, %v397_v53, -inf  ;;  %v430_v8 = vrot.slane %v429_v54, 2  ;;  %v435_v61 = vsel %vm434_vm7, %v397_v53, -inf  ;;  %v444_v62 = vmax.f32 %v442_v50, %v443_v55 }
 0x167   :  { %v421_v63 = vrot.slane %v420_v60, 4  ;;  %v436_v0 = vrot.slane %v435_v61, 4  ;;  %v450_v9 = vsel %vm449_vm6, %v397_v53, -inf  ;;  %v459_v1 = vmax.f32 %v457_v51, %v458_v57 }
 0x168   :  { %v431_v2 = vmax.f32 %v429_v54, %v430_v8  ;;  %v445_v3 = vrot.slane %v444_v62, 2  ;;  %v451_v4 = vrot.slane %v450_v9, 4  ;;  %v464_v5 = vsel %vm419_vm5, %v406_v7, -inf }
 0x169   :  { %v422_v6 = vmax.f32 %v420_v60, %v421_v63  ;;  %v437_v18 = vmax.f32 %v435_v61, %v436_v0  ;;  %v460_v23 = vrot.slane %v459_v1, 2  ;;  %v465_v24 = vrot.slane %v464_v5, 4 }
 0x16a   :  { %v432_v25 = vrot.slane %v431_v2, 1  ;;  %v446_v27 = vmax.f32 %v444_v62, %v445_v3  ;;  %v452_v28 = vmax.f32 %v450_v9, %v451_v4  ;;  %v473_v29 = vmax.f32 %v471_v52, %v472_v58 }
 0x16b   :  { %v423_v30 = vrot.slane %v422_v6, 2  ;;  %v438_v34 = vrot.slane %v437_v18, 2  ;;  %v461_v11 = vmax.f32 %v459_v1, %v460_v23  ;;  %v466_v35 = vmax.f32 %v464_v5, %v465_v24 }
 0x16c   :  { %v2892_v36 = vmax.f32 %v431_v2, %v432_v25  ;;  %v447_v38 = vrot.slane %v446_v27, 1  ;;  %v453_v22 = vrot.slane %v452_v28, 2  ;;  %v474_v33 = vrot.slane %v473_v29, 2 }
 0x16d   :  { %v424_v41 = vmax.f32 %v422_v6, %v423_v30  ;;  %v439_v43 = vmax.f32 %v437_v18, %v438_v34  ;;  %v462_v13 = vrot.slane %v461_v11, 1  ;;  %v467_v44 = vrot.slane %v466_v35, 2 }
 0x16e   :  { %v2894_v19 = vmax.f32 %v446_v27, %v447_v38  ;;  %v454_v20 = vmax.f32 %v452_v28, %v453_v22  ;;  %v475_v45 = vmax.f32 %v473_v29, %v474_v33  ;;  %v478_v15 = vsel %vm434_vm7, %v406_v7, -inf }
 0x16f   :  { %v425_v46 = vrot.slane %v424_v41, 1  ;;  %v440_v42 = vrot.slane %v439_v43, 1  ;;  %v2897_v17 = vmax.f32 %v461_v11, %v462_v13  ;;  %v468_v47 = vmax.f32 %v466_v35, %v467_v44 }
 0x170   :  { %v455_v14 = vrot.slane %v454_v20, 1  ;;  %v476_v21 = vrot.slane %v475_v45, 1  ;;  %v479_v16 = vrot.slane %v478_v15, 4  ;;  %v486_v48 = vrot.slane %v485_v59, 4 }
 0x171   :  { %v426_v49 = vmax.f32 %v424_v41, %v425_v46  ;;  %v441_v50 = vmax.f32 %v439_v43, %v440_v42  ;;  %v469_v51 = vrot.slane %v468_v47, 1  ;;  %v492_v52 = vsel %vm449_vm6, %v406_v7, -inf }
 0x172   :  { %v456_v53 = vmax.f32 %v454_v20, %v455_v14  ;;  %v477_v54 = vmax.f32 %v475_v45, %v476_v21  ;;  %v480_v55 = vmax.f32 %v478_v15, %v479_v16  ;;  %v487_v57 = vmax.f32 %v485_v59, %v486_v48 }
 0x173   :  { %v470_v58 = vmax.f32 %v468_v47, %v469_v51  ;;  %v493_v60 = vrot.slane %v492_v52, 4  ;;  %v499_v8 = vsel %vm449_vm6, %v2858_v10, -inf  ;;  %v506_v61 = vsel %vm419_vm5, %v2884_v56, -inf }
 0x174   :  { %v481_v62 = vrot.slane %v480_v55, 2  ;;  %v488_v63 = vrot.slane %v487_v57, 2  ;;  %v500_v0 = vrot.slane %v499_v8, 4  ;;  %v507_v7 = vrot.slane %v506_v61, 4 }
 0x175   :  { %v494_v9 = vmax.f32 %v492_v52, %v493_v60  ;;  %v515_v59 = vmax.f32 %v2864_v12, %v514_v39  ;;  %v520_v1 = vsel %vm434_vm7, %v2884_v56, -inf  ;;  %v527_v10 = vsel %vm434_vm7, %v2860_v26, -inf }
 0x176   :  { %v482_v2 = vmax.f32 %v480_v55, %v481_v62  ;;  %v489_v3 = vmax.f32 %v487_v57, %v488_v63  ;;  %v501_v4 = vmax.f32 %v499_v8, %v500_v0  ;;  %v508_v5 = vmax.f32 %v506_v61, %v507_v7 }
 0x177   :  { %v495_v6 = vrot.slane %v494_v9, 2  ;;  %v516_v18 = vrot.slane %v515_v59, 2  ;;  %v521_v23 = vrot.slane %v520_v1, 4  ;;  %v528_v24 = vrot.slane %v527_v10, 4 }
 0x178   :  { %v483_v25 = vrot.slane %v482_v2, 1  ;;  %v490_v27 = vrot.slane %v489_v3, 1  ;;  %v502_v28 = vrot.slane %v501_v4, 2  ;;  %v509_v29 = vrot.slane %v508_v5, 2 }
 0x179   :  { %v496_v30 = vmax.f32 %v494_v9, %v495_v6  ;;  %v517_v12 = vmax.f32 %v515_v59, %v516_v18  ;;  %v522_v39 = vmax.f32 %v520_v1, %v521_v23  ;;  %v529_v34 = vmax.f32 %v527_v10, %v528_v24 }
 0x17a   :  { %v484_v11 = vmax.f32 %v482_v2, %v483_v25  ;;  %v491_v35 = vmax.f32 %v489_v3, %v490_v27  ;;  %v503_v38 = vmax.f32 %v501_v4, %v502_v28  ;;  %v510_v26 = vmax.f32 %v508_v5, %v509_v29 }
 0x17b   :  { %v497_v22 = vrot.slane %v496_v30, 1  ;;  %v518_v33 = vrot.slane %v517_v12, 1  ;;  %v523_v41 = vrot.slane %v522_v39, 2  ;;  %v530_v43 = vrot.slane %v529_v34, 2 }
 0x17c   :  { %v504_v13 = vrot.slane %v503_v38, 1  ;;  %v511_v44 = vrot.slane %v510_v26, 1  ;;  %v551_v20 = vsel %vm550_vm8, %v2892_v36, %v426_v49  ;;  %v556_v45 = vsel %vm555_vm9, %v2894_v19, %v441_v50 }
 0x17d   :  { %v498_v15 = vmax.f32 %v496_v30, %v497_v22  ;;  %v519_v46 = vmax.f32 %v517_v12, %v518_v33  ;;  %v524_v42 = vmax.f32 %v522_v39, %v523_v41  ;;  %v531_v47 = vmax.f32 %v529_v34, %v530_v43  ;;  %v2620_v34 = vld [vmem:[%s3211_s1 + $0x34] sm:$0xff]   ;;  %v2623_v22 = vld [vmem:[%s3211_s1 + $0x5c] sm:$0xff]   ;;  %v2624_v43 = vld [vmem:[%s3211_s1 + $0x2c] sm:$0xff]  }
 0x17e   :  { %v505_v14 = vmax.f32 %v503_v38, %v504_v13  ;;  %v512_v21 = vmax.f32 %v510_v26, %v511_v44  ;;  %v561_v16 = vsel %vm560_vm10, %v2897_v17, %v456_v53  ;;  %v566_v48 = vsel %vm565_vm11, %v477_v54, %v470_v58  ;;  %v2621_v38 = vld [vmem:[%s3211_s1 + $0x54] sm:$0xff]   ;;  %v2622_v26 = vld [vmem:[%s3211_s1 + $0x4c] sm:$0xff]   ;;  %v2625_v13 = vld [vmem:[%s3211_s1 + $0x24] sm:$0xff]  }
 0x17f   :  { %v525_v51 = vrot.slane %v524_v42, 1  ;;  %v532_v52 = vrot.slane %v531_v47, 1  ;;  %v570_v55 = vsel %vm550_vm8, %v491_v35, %v484_v11  ;;  %v589_v36 = vsel %vm588_vm12, %v551_v20, %v556_v45  ;;  %v2626_v20 = vld [vmem:[%s3211_s1 + $0x1c] sm:$0xff]  }
 0x180   :  { %v574_v49 = vsel %vm555_vm9, %v505_v14, %v498_v15  ;;  %v578_v19 = vsel %vm560_vm10, %v519_v46, %v512_v21  ;;  %v591_v50 = vsel %vm590_vm4, %v589_v36, %v561_v16  ;;  %v534_v57 = vsel %vm449_vm6, %v2884_v56, -inf }
 0x181   :  { %v526_v60 = vmax.f32 %v524_v42, %v525_v51  ;;  %v533_v8 = vmax.f32 %v531_v47, %v532_v52  ;;  %v592_v17 = vsel %vm112_vm1, %v591_v50, %v566_v48  ;;  %v593_v53 = vsel %vm588_vm12, %v570_v55, %v574_v49 }
 0x182   :  { %v594_v54 = vsel %vm590_vm4, %v593_v53, %v578_v19  ;;  %v535_v58 = vrot.slane %v534_v57, 4  ;;  %v543_v61 = vmax.f32 %v2868_v31, %v542_v40  ;;  %v2939_v31 = vld [vmem:[%s3211_s1 + $0x44] sm:$0xff]   ;;  %v2179_v40 = vld [vmem:[%s3213_s2 + $0x2] ss:$0 sm:$0xff]  ;;  %v2209_v53 = vld [vmem:[%s3213_s2 + $0x3] ss:$0 sm:$0xff] }
 0x183   :  { %v582_v62 = vsel %vm565_vm11, %v533_v8, %v526_v60 }
 0x184   :  { %v595_v63 = vsel %vm112_vm1, %v594_v54, %v582_v62  ;;  %v536_v0 = vmax.f32 %v534_v57, %v535_v58  ;;  %v544_v7 = vrot.slane %v543_v61, 2 }
 0x185   :  { %v596_v56 = vpack.c.bf16 %v595_v63, %v592_v17 }
 0x186   :  { %v537_v9 = vrot.slane %v536_v0, 2  ;;  %v545_v59 = vmax.f32 %v543_v61, %v544_v7 }
 0x187   :  { %2360 = vmatprep.mubr.msk.bf16.mxu1 %vm215_vm3, %v596_v56  ;;  %v2628_v56 = vld [vmem:[%s3211_s1 + $0x6c] sm:$0xff]  }
 0x188   :  { %v538_v1 = vmax.f32 %v536_v0, %v537_v9  ;;  %v546_v10 = vrot.slane %v545_v59, 1 }
 0x18a   :  { %v539_v2 = vrot.slane %v538_v1, 1  ;;  %v547_v3 = vmax.f32 %v545_v59, %v546_v10  ;;  %v2629_v59 = vld [vmem:[%s3211_s1 + $0x74] sm:$0xff]   ;;  %v2631_v10 = vld [vmem:[%s3211_s1 + $0x84] sm:$0xff]  }
 0x18c   :  { %v540_v4 = vmax.f32 %v538_v1, %v539_v2  ;;  %v2630_v1 = vld [vmem:[%s3211_s1 + $0x7c] sm:$0xff]   ;;  %v2210_v2 = vld [vmem:[%s3213_s2 + $0x4] ss:$0 sm:$0xff] }
 0x18e   :  { %v586_v5 = vsel %vm550_vm8, %v547_v3, %v540_v4 }
 0x18f   :  { %v597_v6 = vpack.c.bf16 %v586_v5, %v586_v5 }
 0x191   :  { %2361 = vmatmul.mubr.msk.bf16.vlgmr.msra.gmra.mrb[0].mxu1 %vm215_vm3, %v597_v6 }
 0x192   :  { %2366 = vmatprep.mubr.msk.bf16.mxu1 %vm2658_vm13, %v2657_v37  ;;  %2365 = vmatpush3.bf16.msra.mxu1 %v2939_v31 }
 0x193   :  { %2370 = vmatprep.subr.bf16.mxu1 %v2657_v37 }
 0x264   :  { %v2362_v18 = vpop.f32.mrb[0].mxu1 }
 0x265   :  { %v2950_v23 = vadd.f32 %v2362_v18, %v2179_v40  ;;  %v658_v24 = vpop.f32.mrb[1].mxu1 }
 0x266   :  { %v659_v25 = vadd.f32 %v2179_v40, %v658_v24  ;;  %v2363_v27 = vpop.f32.mrb[2].mxu1  ;;  %v2633_v24 = vld [vmem:[%s3211_s1 + $0x9c] sm:$0xff]  }
 0x267   :  { %v661_v28 = vpop.f32.mrb[3].mxu1  ;;  %v674_v46 = vmax.f32 %v2950_v23, 0.0  ;;  %v2632_v23 = vld [vmem:[%s3211_s1 + $0x8c] sm:$0xff]   ;;  %v2635_v27 = vld [vmem:[%s3211_s1 + $0xa4] sm:$0xff]  }
 0x268   :  { %v662_v29 = vadd.f32 %v2179_v40, %v661_v28  ;;  %v672_v30 = vmax.f32 %v659_v25, 0.0  ;;  %v2634_v25 = vld [vmem:[%s3211_s1 + $0x94] sm:$0xff]   ;;  %v2213_v28 = vld [vmem:[%s3213_s2 + $0x5] ss:$0 sm:$0xff] }
 0x269   :  { %v676_v42 = vpack.c.bf16 %v674_v46, %v674_v46  ;;  %v2644_v46 = vld [vmem:[%s3211_s1 + $0xec] sm:$0xff]  }
 0x26a   :  { %v673_v12 = vmax.f32 %v662_v29, 0.0 }
 0x26c   :  { %v2952_v39 = vpack.c.bf16 %v673_v12, %v672_v30 }
 0x26e   :  { %v682_v11 = vrot.slane %v2952_v39, 1  ;;  %v890_v35 = vrot.slane %v2952_v39, 2  ;;  %v784_v33 = vrot.slane %v2952_v39, 3  ;;  %v837_v41 = vrot.slane %v2952_v39, 4 }
 0x26f   :  { %v1029_v44 = vrot.slane %v2952_v39, 5  ;;  %v1170_v45 = vrot.slane %v2952_v39, 6  ;;  %v1215_v15 = vrot.slane %v2952_v39, 7 }
 0x270   :  { %2367 = vmatmul.mubr.msk.bf16.vlgmr.msra.gmra.mrb[4].mxu1 %vm689_vm14, %v682_v11  ;;  %2391 = vmatmul.mubr.msk.bf16.vlgmr.msra.gmra.mrb[16].mxu0 %vm689_vm14, %v890_v35  ;;  %v2636_v35 = vld [vmem:[%s3211_s1 + $0xbc] sm:$0xff]  }
 0x271   :  { %2371 = vmatpush3.bf16.msra.mxu1 %v2794_v32  ;;  %2395 = vmatpush3.bf16.msra.mxu0 %v2620_v34 }
 0x272   :  { %2372 = vmatprep.mubr.msk.bf16.mxu1 %vm2658_vm13, %v2657_v37  ;;  %2376 = vmatprep.subr.bf16.mxu1 %v2657_v37 }
 0x273   :  { %2396 = vmatprep.mubr.msk.bf16.mxu0 %vm2658_vm13, %v2657_v37  ;;  %2400 = vmatprep.subr.bf16.mxu0 %v2657_v37 }
 0x27c   :  { %2373 = vmatmul.mubr.msk.bf16.vlgmr.msra.gmra.mrb[4].mxu1 %vm689_vm14, %v2952_v39  ;;  %2397 = vmatmul.mubr.msk.bf16.vlgmr.msra.gmra.mrb[16].mxu0 %vm689_vm14, %v682_v11 }
 0x27d   :  { %2377 = vmatpush3.bf16.msra.mxu1 %v2621_v38  ;;  %2401 = vmatpush3.bf16.msra.mxu0 %v2622_v26  ;;  %v2637_v26 = vld [vmem:[%s3211_s1 + $0xac] sm:$0xff]  }
 0x27e   :  { %2378 = vmatprep.mubr.msk.bf16.mxu1 %vm2658_vm13, %v2657_v37  ;;  %2382 = vmatprep.subr.bf16.mxu1 %v2657_v37 }
 0x27f   :  { %2402 = vmatprep.mubr.msk.bf16.mxu0 %vm2658_vm13, %v2657_v37  ;;  %2406 = vmatprep.subr.bf16.mxu0 %v2657_v37 }
 0x288   :  { %2379 = vmatmul.mubr.msk.bf16.vlgmr.msra.gmra.mrb[4].mxu1 %vm689_vm14, %v784_v33  ;;  %2403 = vmatmul.mubr.msk.bf16.vlgmr.msra.gmra.mrb[16].mxu0 %vm689_vm14, %v837_v41 }
 0x289   :  { %2383 = vmatpush3.bf16.msra.mxu1 %v2623_v22  ;;  %2407 = vmatpush3.bf16.msra.mxu0 %v2621_v38 }
 0x28a   :  { %2384 = vmatprep.mubr.msk.bf16.mxu1 %vm2658_vm13, %v2657_v37  ;;  %2408 = vmatprep.mubr.msk.bf16.mxu0 %vm2658_vm13, %v2657_v37 }
 0x28b   :  { %2412 = vmatprep.subr.bf16.mxu1 %v2657_v37  ;;  %2436 = vmatprep.subr.bf16.mxu0 %v2657_v37 }
 0x294   :  { %2385 = vmatmul.mubr.msk.bf16.vlgmr.msra.gmra.mrb[4].mxu1 %vm689_vm14, %v837_v41  ;;  %2409 = vmatmul.mubr.msk.bf16.vlgmr.msra.gmra.mrb[16].mxu0 %vm689_vm14, %v1029_v44 }
 0x295   :  { %2413 = vmatpush3.bf16.msra.mxu1 %v2624_v43  ;;  %2437 = vmatpush3.bf16.msra.mxu0 %v2625_v13 }
 0x296   :  { %2414 = vmatprep.mubr.msk.bf16.mxu1 %vm2658_vm13, %v2657_v37  ;;  %2418 = vmatprep.subr.bf16.mxu1 %v2657_v37 }
 0x297   :  { %2438 = vmatprep.mubr.msk.bf16.mxu0 %vm2658_vm13, %v2657_v37  ;;  %2442 = vmatprep.subr.bf16.mxu0 %v2657_v37 }
 0x29c   :  { %2415 = vmatmul.mubr.msk.bf16.vlgmr.msra.gmra.mrb[8].mxu1 %vm689_vm14, %v837_v41  ;;  %2439 = vmatmul.mubr.msk.bf16.vlgmr.msra.gmra.mrb[20].mxu0 %vm689_vm14, %v1029_v44  ;;  %v2640_v44 = vld [vmem:[%s3211_s1 + $0xcc] sm:$0xff]  }
 0x29d   :  { %2419 = vmatpush3.bf16.msra.mxu1 %v2625_v13  ;;  %2443 = vmatpush3.bf16.msra.mxu0 %v2626_v20  ;;  %v2641_v20 = vld [vmem:[%s3211_s1 + $0xd4] sm:$0xff]  }
 0x29e   :  { %2420 = vmatprep.mubr.msk.bf16.mxu1 %vm2658_vm13, %v2657_v37  ;;  %2424 = vmatprep.subr.bf16.mxu1 %v2657_v37 }
 0x29f   :  { %2444 = vmatprep.mubr.msk.bf16.mxu0 %vm2658_vm13, %v2657_v37  ;;  %2448 = vmatprep.subr.bf16.mxu0 %v2657_v37 }
 0x2a8   :  { %2421 = vmatmul.mubr.msk.bf16.vlgmr.msra.gmra.mrb[8].mxu1 %vm689_vm14, %v784_v33  ;;  %2445 = vmatmul.mubr.msk.bf16.vlgmr.msra.gmra.mrb[20].mxu0 %vm689_vm14, %v837_v41  ;;  %v2638_v33 = vld [vmem:[%s3211_s1 + $0xc4] sm:$0xff]   ;;  %v2639_v41 = vld [vmem:[%s3211_s1 + $0xb4] sm:$0xff]  }
 0x2a9   :  { %2425 = vmatpush3.bf16.msra.mxu1 %v2794_v32  ;;  %2449 = vmatpush3.bf16.msra.mxu0 %v2620_v34 }
 0x2aa   :  { %2426 = vmatprep.mubr.msk.bf16.mxu1 %vm2658_vm13, %v2657_v37  ;;  %2430 = vmatprep.subr.bf16.mxu1 %v2657_v37 }
 0x2ab   :  { %2450 = vmatprep.mubr.msk.bf16.mxu0 %vm2658_vm13, %v2657_v37  ;;  %2454 = vmatprep.subr.bf16.mxu0 %v2657_v37 }
 0x2b4   :  { %2427 = vmatmul.mubr.msk.bf16.vlgmr.msra.gmra.mrb[8].mxu1 %vm689_vm14, %v1170_v45  ;;  %2451 = vmatmul.mubr.msk.bf16.vlgmr.msra.gmra.mrb[20].mxu0 %vm689_vm14, %v1215_v15  ;;  %v2642_v45 = vld [vmem:[%s3211_s1 + $0xdc] sm:$0xff]  }
 0x2b5   :  { %2431 = vmatpush3.bf16.msra.mxu1 %v2939_v31  ;;  %2455 = vmatpush3.bf16.msra.mxu0 %v2794_v32  ;;  %v2627_v32 = vld [vmem:[%s3211_s1 + $0x64] sm:$0xff]  }
 0x2b6   :  { %2432 = vmatprep.mubr.msk.bf16.mxu1 %vm2658_vm13, %v2657_v37  ;;  %2456 = vmatprep.mubr.msk.bf16.mxu0 %vm2658_vm13, %v2657_v37 }
 0x2b7   :  { %2460 = vmatprep.subr.bf16.mxu1 %v2657_v37  ;;  %2478 = vmatprep.subr.bf16.mxu0 %v2657_v37 }
 0x2c0   :  { %2433 = vmatmul.mubr.msk.bf16.vlgmr.msra.gmra.mrb[8].mxu1 %vm689_vm14, %v1215_v15  ;;  %2457 = vmatmul.mubr.msk.bf16.vlgmr.msra.gmra.mrb[20].mxu0 %vm689_vm14, %v676_v42  ;;  %v2643_v15 = vld [vmem:[%s3211_s1 + $0xe4] sm:$0xff]   ;;  %v2645_v42 = vld [vmem:[%s3211_s1 + $0xf4] sm:$0xff]  }
 0x2c1   :  { %2462 = vmatprep.mubr.msk.bf16.mxu1 %vm2658_vm13, %v2657_v37  ;;  %2482 = vmatprep.mubr.msk.bf16.mxu0 %vm2658_vm13, %v2657_v37 }
 0x2c2   :  { %2461 = vmatpush3.bf16.msra.mxu1 %v2627_v32  ;;  %2479 = vmatpush3.bf16.msra.mxu0 %v2633_v24  ;;  %v2646_v32 = vld [vmem:[%s3211_s1 + $0xfc] sm:$0xff]  }
 0x2c3   :  { %2466 = vmatprep.subr.bf16.mxu1 %v2657_v37  ;;  %2480 = vmatprep.subr.bf16.mxu0 %v2657_v37 }
 0x2c6   :  { %2481 = vmatpush3.bf16.msra.mxu0 %v2635_v27 }
 0x2c7   :  { %2494 = vmatprep.subr.bf16.mxu0 %v2657_v37 }
 0x367   :  { %v881_v47 = vpop.f32.mrb[4].mxu1  ;;  %v1067_v14 = vpop.f32.mrb[16].mxu0 }
 0x368   :  { %v1434_v21 = vrot.slane %v1067_v14, 6  ;;  %v2386_v16 = vpop.f32.mrb[5].mxu1  ;;  %v2410_v48 = vpop.f32.mrb[17].mxu0 }
 0x369   :  { %v884_v51 = vpop.f32.mrb[6].mxu1  ;;  %v1070_v52 = vpop.f32.mrb[18].mxu0 }
 0x36a   :  { %v1442_v55 = vsel %vm588_vm12, %v881_v47, %v1434_v21  ;;  %v2387_v36 = vpop.f32.mrb[7].mxu1  ;;  %v2411_v49 = vpop.f32.mrb[19].mxu0  ;;  %v2647_v47 = vld [vmem:[%s3211_s1 + $0x104] sm:$0xff]  }
 0x393   :  { %v1253_v19 = vpop.f32.mrb[8].mxu1  ;;  %v1426_v50 = vpop.f32.mrb[20].mxu0 }
 0x394   :  { %v1437_v57 = vrot.slane %v1253_v19, 4  ;;  %v1440_v60 = vrot.slane %v1426_v50, 2  ;;  %v2434_v8 = vpop.f32.mrb[9].mxu1  ;;  %v2458_v17 = vpop.f32.mrb[21].mxu0 }
 0x395   :  { %v1256_v54 = vpop.f32.mrb[10].mxu1  ;;  %v1429_v58 = vpop.f32.mrb[22].mxu0 }
 0x396   :  { %v1443_v61 = vsel %vm590_vm4, %v1442_v55, %v1437_v57  ;;  %v2435_v62 = vpop.f32.mrb[11].mxu1  ;;  %v2459_v63 = vpop.f32.mrb[23].mxu0  ;;  %v2231_v54 = vld [vmem:[%s3213_s2 + $0x6] ss:$0 sm:$0xff] }
 0x397   :  { %v1444_v0 = vsel %vm112_vm1, %v1443_v61, %v1440_v60 }
 0x398   :  { %v1450_v7 = vadd.f32 %v2209_v53, %v1444_v0 }
 0x39a   :  { %v1451_v9 = vpack.c.bf16 %v1450_v7, %v1450_v7  ;;  %v2648_v7 = vld [vmem:[%s3211_s1 + $0x10c] sm:$0xff]  }
 0x39c   :  { %2463 = vmatmul.mubr.msk.bf16.vlgmr.msra.gmra.mrb[12].mxu1 %vm689_vm14, %v1451_v9  ;;  %v2650_v9 = vld [vmem:[%s3211_s1 + $0x11c] sm:$0xff]  }
 0x39d   :  { %2467 = vmatpush3.bf16.msra.mxu1 %v2628_v56  ;;  %2474 = vmatprep.mubr.msk.bf16.mxu1 %vm2658_vm13, %v2657_v37  ;;  %v2649_v56 = vld [vmem:[%s3211_s1 + $0x114] sm:$0xff]  }
 0x39e   :  { %2468 = vmatprep.subr.bf16.mxu1 %v2657_v37 }
 0x3a1   :  { %2469 = vmatpush3.bf16.msra.mxu1 %v2629_v59  ;;  %v2232_v59 = vld [vmem:[%s3213_s2 + $0x7] ss:$0 sm:$0xff] }
 0x3a2   :  { %2470 = vmatprep.subr.bf16.mxu1 %v2657_v37 }
 0x3a5   :  { %2471 = vmatpush3.bf16.msra.mxu1 %v2630_v1 }
 0x3a6   :  { %2472 = vmatprep.subr.bf16.mxu1 %v2657_v37 }
 0x3a9   :  { %2473 = vmatpush3.bf16.msra.mxu1 %v2631_v10 }
 0x3aa   :  { %2486 = vmatprep.subr.bf16.mxu1 %v2657_v37 }
 0x46f   :  { %v1502_v3 = vpop.f32.mrb[12].mxu1 }
 0x470   :  { %v1503_v4 = vadd.f32 %v2210_v2, %v1502_v3  ;;  %v2464_v5 = vpop.f32.mrb[13].mxu1 }
 0x471   :  { %v1505_v6 = vpop.f32.mrb[14].mxu1 }
 0x472   :  { %v1508_v31 = vmax.f32 %v1503_v4, 0.0  ;;  %v2465_v40 = vpop.f32.mrb[15].mxu1 }
 0x473   :  { %v2236_v40 = vld [vmem:[%s3213_s2 + $0x8] ss:$0 sm:$0xff] }
 0x474   :  { %v1509_v18 = vpack.c.bf16 %v1508_v31, %v1508_v31  ;;  %v2651_v31 = vld [vmem:[%s3211_s1 + $0x124] sm:$0xff]  }
 0x476   :  { %2475 = vmatmul.mubr.msk.bf16.vlgmr.msra.gmra.mrb[16].mxu1 %vm1547_vm15, %v1509_v18 }
 0x477   :  { %2490 = vmatprep.mubr.msk.bf16.mxu1 %vm2658_vm13, %v2657_v37  ;;  %2487 = vmatpush3.bf16.msra.mxu1 %v2632_v23 }
 0x478   :  { %2488 = vmatprep.subr.bf16.mxu1 %v2657_v37 }
 0x47b   :  { %2489 = vmatpush3.bf16.msra.mxu1 %v2634_v25 }
 0x47c   :  { %2502 = vmatprep.subr.bf16.mxu1 %v2657_v37 }
 0x549   :  { %v1585_v29 = vpop.f32.mrb[16].mxu1 }
 0x54a   :  { %v1586_v30 = vadd.f32 %v2213_v28, %v1585_v29  ;;  %v2476_v12 = vpop.f32.mrb[17].mxu1  ;;  %v2652_v29 = vld [vmem:[%s3211_s1 + $0x12c] sm:$0xff]  }
 0x54b   :  { %v1588_v39 = vpop.f32.mrb[18].mxu1  ;;  %v2653_v12 = vld [vmem:[%s3211_s1 + $0x134] sm:$0xff]  }
 0x54c   :  { %v1591_v34 = vmax.f32 %v1586_v30, 0.0  ;;  %v2477_v11 = vpop.f32.mrb[19].mxu1  ;;  %v2245_v39 = vld [vmem:[%s3213_s2 + $0x9] ss:$0 sm:$0xff] }
 0x54e   :  { %v1592_v38 = vpack.c.bf16 %v1591_v34, %v1591_v34 }
 0x550   :  { %v1602_v22 = vrot.slane %v1592_v38, 1  ;;  %2491 = vmatmul.mubr.msk.bf16.vlgmr.msra.gmra.mrb[20].mxu1 %vm1615_vm0, %v1592_v38  ;;  %v1779_v43 = vrot.slane %v1592_v38, 3  ;;  %v1718_v13 = vrot.slane %v1592_v38, 2 }
 0x551   :  { %2503 = vmatpush3.bf16.msra.mxu1 %v2636_v35  ;;  %2506 = vmatprep.mubr.msk.bf16.mxu1 %vm2658_vm13, %v2657_v37 }
 0x552   :  { %2483 = vmatmul.mubr.msk.bf16.vlgmr.msra.gmra.mrb[24].mxu0 %vm1615_vm0, %v1602_v22  ;;  %2504 = vmatprep.subr.bf16.mxu1 %v2657_v37 }
 0x553   :  { %2495 = vmatpush3.bf16.msra.mxu0 %v2637_v26  ;;  %2498 = vmatprep.mubr.msk.bf16.mxu0 %vm2658_vm13, %v2657_v37 }
 0x554   :  { %2496 = vmatprep.subr.bf16.mxu0 %v2657_v37 }
 0x555   :  { %2505 = vmatpush3.bf16.msra.mxu1 %v2638_v33 }
 0x556   :  { %2518 = vmatprep.subr.bf16.mxu1 %v2657_v37 }
 0x557   :  { %2497 = vmatpush3.bf16.msra.mxu0 %v2639_v41 }
 0x558   :  { %2507 = vmatmul.mubr.msk.bf16.vlgmr.msra.gmra.mrb[24].mxu1 %vm1615_vm0, %v1779_v43  ;;  %2510 = vmatprep.subr.bf16.mxu0 %v2657_v37 }
 0x559   :  { %2534 = vmatprep.mubr.msk.bf16.mxu1 %vm2658_vm13, %v2657_v37  ;;  %2519 = vmatpush3.bf16.msra.mxu1 %v2642_v45 }
 0x55a   :  { %2499 = vmatmul.mubr.msk.bf16.vlgmr.msra.gmra.mrb[28].mxu0 %vm1615_vm0, %v1718_v13  ;;  %2520 = vmatprep.subr.bf16.mxu1 %v2657_v37 }
 0x55b   :  { %2514 = vmatprep.mubr.msk.bf16.mxu0 %vm2658_vm13, %v2657_v37  ;;  %2511 = vmatpush3.bf16.msra.mxu0 %v2640_v44 }
 0x55c   :  { %2512 = vmatprep.subr.bf16.mxu0 %v2657_v37 }
 0x55d   :  { %2521 = vmatpush3.bf16.msra.mxu1 %v2643_v15 }
 0x55e   :  { %2522 = vmatprep.subr.bf16.mxu1 %v2657_v37 }
 0x55f   :  { %2513 = vmatpush3.bf16.msra.mxu0 %v2641_v20 }
 0x560   :  { %2538 = vmatprep.subr.bf16.mxu0 %v2657_v37 }
 0x561   :  { %2523 = vmatpush3.bf16.msra.mxu1 %v2644_v46 }
 0x562   :  { %2524 = vmatprep.subr.bf16.mxu1 %v2657_v37 }
 0x565   :  { %2525 = vmatpush3.bf16.msra.mxu1 %v2645_v42 }
 0x566   :  { %2526 = vmatprep.subr.bf16.mxu1 %v2657_v37 }
 0x569   :  { %2527 = vmatpush3.bf16.msra.mxu1 %v2646_v32 }
 0x56a   :  { %2528 = vmatprep.subr.bf16.mxu1 %v2657_v37 }
 0x56d   :  { %2529 = vmatpush3.bf16.msra.mxu1 %v2647_v47 }
 0x56e   :  { %2530 = vmatprep.subr.bf16.mxu1 %v2657_v37 }
 0x571   :  { %2531 = vmatpush3.bf16.msra.mxu1 %v2648_v7 }
 0x572   :  { %2532 = vmatprep.subr.bf16.mxu1 %v2657_v37 }
 0x575   :  { %2533 = vmatpush3.bf16.msra.mxu1 %v2649_v56 }
 0x623   :  { %v1708_v14 = vpop.f32.mrb[20].mxu1 }
 0x624   :  { %v2492_v21 = vpop.f32.mrb[21].mxu1 }
 0x625   :  { %v1653_v16 = vpop.f32.mrb[24].mxu0  ;;  %v1711_v48 = vpop.f32.mrb[22].mxu1 }
 0x626   :  { %v1709_v51 = vadd.f32 %v1708_v14, %v1653_v16  ;;  %v2484_v52 = vpop.f32.mrb[25].mxu0  ;;  %v2493_v55 = vpop.f32.mrb[23].mxu1 }
 0x627   :  { %v1656_v36 = vpop.f32.mrb[26].mxu0 }
 0x628   :  { %v2485_v49 = vpop.f32.mrb[27].mxu0 }
 0x62b   :  { %v1829_v19 = vpop.f32.mrb[24].mxu1 }
 0x62c   :  { %v2508_v50 = vpop.f32.mrb[25].mxu1 }
 0x62d   :  { %v1768_v57 = vpop.f32.mrb[28].mxu0  ;;  %v1832_v60 = vpop.f32.mrb[26].mxu1 }
 0x62e   :  { %v1774_v8 = vadd.f32 %v1768_v57, %v1709_v51  ;;  %v2500_v17 = vpop.f32.mrb[29].mxu0  ;;  %v2509_v53 = vpop.f32.mrb[27].mxu1 }
 0x62f   :  { %v1771_v58 = vpop.f32.mrb[30].mxu0 }
 0x630   :  { %v1835_v61 = vadd.f32 %v1829_v19, %v1774_v8  ;;  %v2501_v62 = vpop.f32.mrb[31].mxu0 }
 0x632   :  { %v1841_v63 = vadd.f32 %v2231_v54, %v1835_v61 }
 0x634   :  { %v1842_v0 = vpack.c.bf16 %v1841_v63, %v1841_v63 }
 0x636   :  { %2515 = vmatmul.mubr.msk.bf16.vlgmr.msra.gmra.mrb[32].mxu0 %vm1615_vm0, %v1842_v0 }
 0x637   :  { %2542 = vmatprep.mubr.msk.bf16.mxu0 %vm2658_vm13, %v2657_v37  ;;  %2539 = vmatpush3.bf16.msra.mxu0 %v2650_v9 }
 0x638   :  { %2540 = vmatprep.subr.bf16.mxu0 %v2657_v37 }
 0x63b   :  { %2541 = vmatpush3.bf16.msra.mxu0 %v2651_v31 }
 0x63c   :  { %2546 = vmatprep.subr.bf16.mxu0 %v2657_v37 }
 0x709   :  { %v1901_v1 = vpop.f32.mrb[32].mxu0 }
 0x70a   :  { %v1902_v10 = vadd.f32 %v2232_v59, %v1901_v1  ;;  %v2516_v2 = vpop.f32.mrb[33].mxu0 }
 0x70b   :  { %v1904_v3 = vpop.f32.mrb[34].mxu0 }
 0x70c   :  { %v1907_v4 = vmax.f32 %v1902_v10, 0.0  ;;  %v2517_v5 = vpop.f32.mrb[35].mxu0 }
 0x70e   :  { %v1908_v6 = vpack.c.bf16 %v1907_v4, %v1907_v4 }
 0x710   :  { %2535 = vmatmul.mubr.bf16.vlgmr.msra.gmra.mrb[28].mxu1 %v1908_v6 }
 0x7e3   :  { %v2012_v18 = vpop.f32.mrb[28].mxu1 }
 0x7e4   :  { %v2013_v23 = vadd.f32 %v2236_v40, %v2012_v18  ;;  %v2536_v24 = vpop.f32.mrb[29].mxu1 }
 0x7e5   :  { %v2015_v25 = vpop.f32.mrb[30].mxu1 }
 0x7e6   :  { %v2018_v27 = vmax.f32 %v2013_v23, 0.0  ;;  %v2537_v28 = vpop.f32.mrb[31].mxu1 }
 0x7e8   :  { %v2019_v30 = vpack.c.bf16 %v2018_v27, %v2018_v27 }
 0x7ea   :  { %2543 = vmatmul.mubr.msk.bf16.vlgmr.msra.gmra.mrb[36].mxu0 %vm1615_vm0, %v2019_v30 }
 0x7eb   :  { %2547 = vmatpush3.bf16.msra.mxu0 %v2652_v29  ;;  %2550 = vmatprep.mubr.msk.bf16.mxu0 %vm2658_vm13, %v2657_v37 }
 0x7ec   :  { %2548 = vmatprep.subr.bf16.mxu0 %v2657_v37  ;;  %v2249_v37 = vld [vmem:[%s3213_s2 + $0xa] ss:$0 sm:$0xff] }
 0x7ef   :  { %2549 = vmatpush3.bf16.msra.mxu0 %v2653_v12 }
 0x8bd   :  { %v2078_v34 = vpop.f32.mrb[36].mxu0 }
 0x8be   :  { %v2079_v11 = vadd.f32 %v2245_v39, %v2078_v34  ;;  %v2544_v35 = vpop.f32.mrb[37].mxu0 }
 0x8bf   :  { %v2081_v38 = vpop.f32.mrb[38].mxu0 }
 0x8c0   :  { %v2084_v26 = vpack.c.bf16 %v2079_v11, %v2079_v11  ;;  %v2545_v22 = vpop.f32.mrb[39].mxu0 }
 0x8c2   :  { %2551 = vmatmul.mubr.msk.bf16.vlgmr.msra.gmra.mrb[40].mxu0 %vm1615_vm0, %v2084_v26 }
 0x995   :  { %v2143_v33 = vpop.f32.mrb[40].mxu0 }
 0x996   :  { %v2144_v41 = vadd.f32 %v2249_v37, %v2143_v33  ;;  %v2552_v43 = vpop.f32.mrb[41].mxu0 }
 0x997   :  { %v2146_v13 = vpop.f32.mrb[42].mxu0 }
 0x998   :  { %v2149_v44 = vmax.f32 %v2144_v41, 0.0  ;;  %v2553_v20 = vpop.f32.mrb[43].mxu0 }
 0x99a   :  { %v2151_v45 = vrot.slane %v2149_v44, 6 }
 0x99c   :  { %v2153_v15 = vsel %vm588_vm12, %v1907_v4, %v2151_v45 }
 0x99d   :  { %2154 = vst [vmem:[%s3214_s3] sm:$0xf] %v2153_v15 }

</bundles_post_ra>
